<compile_context>
chip_gen: v7x
topology: tpu7x:2x2x1
jax: 0.10.0
libtpu: 0.0.40
codegen_flags: <defaults>
</compile_context>

<pallas_src>
import functools

import jax
import jax.numpy as jnp
from jax.experimental import pallas as pl
from jax.experimental.pallas import tpu as pltpu


def _round_up(v, m):
    return (v + m - 1) // m * m


def _fused_gcn_kernel(a_ref, x_ref, w_ref, b_ref, o_ref,
                      acc_ref, h0_ref, h1_ref,
                      *, n_layers, tm, tk, a_resident):
    """Fused multi-layer GCN.  Grid = (layer, row_tile, k_tile).

    Per layer l:  h_{l+1} = act_l( (A_hat @ h_l) @ W_l + b_l )
    h_l lives in VMEM scratch (static ping/pong between h0_ref / h1_ref);
    layer 0 reads x straight from the streamed x_ref tile.
    """
    l = pl.program_id(0)
    r = pl.program_id(1)
    k = pl.program_id(2)
    nk = pl.num_programs(2)

    r_start = pl.multiple_of(r * tm, tm)
    k_start = pl.multiple_of(k * tk, tk)

    # Zero the f32 accumulator at the start of every (layer, row_tile) pass.
    @pl.when(k == 0)
    def _():
        acc_ref[...] = jnp.zeros_like(acc_ref)

    # A tile: either a dynamic slice of the resident full-A buffer, or the
    # streamed (tm, tk) block delivered by the pipeline.
    if a_resident:
        a_tile = a_ref[pl.ds(r_start, tm), pl.ds(k_start, tk)]
    else:
        a_tile = a_ref[...]

    def accum(h_tile):
        # acc += A_hat[r_tile, k_tile] @ h_in[k_tile, :]  (bf16 x bf16 -> f32)
        acc_ref[...] += jnp.dot(a_tile, h_tile,
                                preferred_element_type=jnp.float32)

    # Layer 0 reads the streamed x tile; later layers read the ping-pong
    # scratch written by the previous layer (static parity, no dyn indexing).
    @pl.when(l == 0)
    def _():
        accum(x_ref[...])

    @pl.when((l != 0) & (l % 2 == 1))
    def _():
        accum(h0_ref[pl.ds(k_start, tk), :])

    @pl.when((l != 0) & (l % 2 == 0))
    def _():
        accum(h1_ref[pl.ds(k_start, tk), :])

    # Finalize only on the last k tile: (A@h) @ W + b, ReLU for hidden layers.
    @pl.when(k == nk - 1)
    def _():
        y = jnp.dot(acc_ref[...].astype(jnp.bfloat16), w_ref[0],
                    preferred_element_type=jnp.float32)
        y = y + b_ref[0]

        @pl.when(l < n_layers - 1)
        def _():
            y_act = jnp.maximum(y, 0.0).astype(h0_ref.dtype)

            @pl.when(l % 2 == 0)
            def _():
                h0_ref[pl.ds(r_start, tm), :] = y_act

            @pl.when(l % 2 == 1)
            def _():
                h1_ref[pl.ds(r_start, tm), :] = y_act

        @pl.when(l == n_layers - 1)
        def _():
            o_ref[...] = y.astype(o_ref.dtype)


def fused_gcn_forward(a_hat, x, weights, biases, *, force_stream=False):
    """Run the whole Net4 forward (4 GCN applications) in one Pallas kernel.

    a_hat:   (N, N) float32 normalized adjacency.
    x:       (N, F0) float32 node features.
    weights: list of (F_in, F_out) float32 (len = number of layers).
    biases:  list of (F_out,) float32.
    Returns  (N, F_out_last) float32.
    """
    n = a_hat.shape[0]
    n_layers = len(weights)
    last_layer = n_layers - 1
    f_max = max([w.shape[0] for w in weights] + [w.shape[1] for w in weights])
    f_pad = _round_up(max(f_max, 128), 128)          # lane-dense feature dim

    # Generation-aware VMEM budget: ~3/4 of physical (96 MiB on v5e/v6e,
    # 48 MiB on v7x); conservative fallback if the query is unavailable.
    vmem_limit = 48 * 1024 * 1024
    try:
        phys = getattr(pltpu.get_tpu_info(), "vmem_capacity_bytes", None)
        if phys:
            vmem_limit = int(phys) * 3 // 4
    except Exception:
        pass
    vmem_limit = max(vmem_limit, 32 * 1024 * 1024)

    # Row / contraction tile.  512 amortizes per-step overhead; small graphs
    # round up to 128 so everything stays lane-dense (no masked vregs).
    if n >= 512:
        tile = 512
    else:
        tile = _round_up(n, 128)
    n_pad = _round_up(n, tile)
    tm = tk = tile

    # Resident-A fast path: keep the whole normalized adjacency in VMEM and
    # reuse it across all layers (budgeted for double-buffering to be safe).
    h_bytes = 2 * n_pad * f_pad * 2          # two bf16 ping-pong h buffers
    acc_bytes = tm * f_pad * 4               # f32 accumulator
    a_res_bytes = 2 * n_pad * n_pad * 2      # full A_hat, bf16, x2 buffers
    misc_bytes = 4 * 1024 * 1024             # W/b/x blocks + compiler scratch
    a_resident = (not force_stream) and (
        a_res_bytes + h_bytes + acc_bytes + misc_bytes <= int(vmem_limit * 0.8))

    # bf16 MXU operands (halves the dominant A_hat HBM stream), f32 accumulate.
    a_p = jnp.zeros((n_pad, n_pad), jnp.bfloat16)
    a_p = a_p.at[:n, :n].set(a_hat.astype(jnp.bfloat16))
    x_p = jnp.zeros((n_pad, f_pad), jnp.bfloat16)
    x_p = x_p.at[:n, :x.shape[1]].set(x.astype(jnp.bfloat16))

    w_stack = jnp.zeros((n_layers, f_pad, f_pad), jnp.bfloat16)
    b_stack = jnp.zeros((n_layers, 1, f_pad), jnp.float32)
    for i, (w, b) in enumerate(zip(weights, biases)):
        w_stack = w_stack.at[i, :w.shape[0], :w.shape[1]].set(
            w.astype(jnp.bfloat16))
        b_stack = b_stack.at[i, 0, :b.shape[0]].set(b.astype(jnp.float32))

    grid = (n_layers, n_pad // tm, n_pad // tk)
    kernel = functools.partial(_fused_gcn_kernel, n_layers=n_layers,
                               tm=tm, tk=tk, a_resident=a_resident)

    if a_resident:
        # One-time DMA, held resident for all layers.
        a_spec = pl.BlockSpec((n_pad, n_pad), lambda l, r, k: (0, 0))
    else:
        # Streamed tiles, double-buffered by the pipeline.
        a_spec = pl.BlockSpec((tm, tk), lambda l, r, k: (r, k))

    # x tiles stream only while layer 0 runs; afterwards the index collapses
    # to a constant so the block is never re-fetched.
    x_spec = pl.BlockSpec((tk, f_pad),
                          lambda l, r, k: (jnp.where(l == 0, k, 0), 0))
    w_spec = pl.BlockSpec((1, f_pad, f_pad), lambda l, r, k: (l, 0, 0))
    b_spec = pl.BlockSpec((1, 1, f_pad), lambda l, r, k: (l, 0, 0))
    # Output blocks advance only during the LAST layer -> no garbage flushes
    # of never-written blocks for earlier layers.
    out_spec = pl.BlockSpec(
        (tm, f_pad), lambda l, r, k: (jnp.where(l == last_layer, r, 0), 0))

    out_p = pl.pallas_call(
        kernel,
        out_shape=jax.ShapeDtypeStruct((n_pad, f_pad), jnp.float32),
        grid_spec=pltpu.PrefetchScalarGridSpec(
            num_scalar_prefetch=0,
            grid=grid,
            in_specs=[a_spec, x_spec, w_spec, b_spec],
            out_specs=out_spec,
            scratch_shapes=[
                pltpu.VMEM((tm, f_pad), jnp.float32),      # f32 accumulator
                pltpu.VMEM((n_pad, f_pad), jnp.bfloat16),  # h ping
                pltpu.VMEM((n_pad, f_pad), jnp.bfloat16),  # h pong
            ],
        ),
        compiler_params=pltpu.CompilerParams(
            # Row axis must stay sequential: layer l+1 reads all rows of layer
            # l from per-core VMEM scratch (cannot megacore-shard this fusion).
            dimension_semantics=("arbitrary", "arbitrary", "arbitrary"),
            vmem_limit_bytes=vmem_limit,
        ),
    )(a_p, x_p, w_stack, b_stack)

    return out_p[:n, :weights[-1].shape[1]]


def build_norm_adj(edge_index, num_nodes):
    """Dense symmetric-normalized adjacency with self-loops (PyG gcn_norm).

    Duplicate non-self-loop edges accumulate (scatter-add); every node gets
    exactly one self-loop of weight 1 (add_remaining_self_loops semantics).
    """
    src = edge_index[0]
    dst = edge_index[1]
    not_self = (src != dst).astype(jnp.float32)
    a = jnp.zeros((num_nodes, num_nodes), jnp.float32)
    a = a.at[dst, src].add(not_self)          # message flows src -> dst
    idx = jnp.arange(num_nodes)
    a = a.at[idx, idx].set(1.0)               # exactly one self-loop, weight 1
    deg = a.sum(axis=1)                       # in-degree (dst) convention
    dinv_sqrt = jnp.where(deg > 0.0, jax.lax.rsqrt(deg), 0.0)
    return dinv_sqrt[:, None] * a * dinv_sqrt[None, :]


def _net4_reference(a_hat, x, weights, biases):
    """Pure-JAX f32 reference of the same forward pass (for self-check)."""
    h = x.astype(jnp.float32)
    n_layers = len(weights)
    for i, (w, b) in enumerate(zip(weights, biases)):
        h = a_hat @ (h @ w) + b
        if i < n_layers - 1:
            h = jnp.maximum(h, 0.0)
    return h


class Net4Pallas:
    def __init__(self, hidden_size, key):
        k1, k2, k3 = jax.random.split(key, 3)
        # GCNConv weights: [in_features, out_features], bias: [out_features].
        self.w1 = jax.random.normal(k1, (1, hidden_size), jnp.float32)
        self.b1 = jnp.zeros((hidden_size,), jnp.float32)
        self.w2 = (jax.random.normal(k2, (hidden_size, hidden_size), jnp.float32)
                   * (1.0 / jnp.sqrt(hidden_size)))
        self.b2 = jnp.zeros((hidden_size,), jnp.float32)
        self.w3 = (jax.random.normal(k3, (hidden_size, 1), jnp.float32)
                   * (1.0 / jnp.sqrt(hidden_size)))
        self.b3 = jnp.zeros((1,), jnp.float32)

    def layer_params(self):
        # conv1+relu, [dropout=id], conv2+relu, [dropout=id], conv2+relu,
        # [dropout=id], conv3  (conv2 weights reused, as in the reference).
        ws = [self.w1, self.w2, self.w2, self.w3]
        bs = [self.b1, self.b2, self.b2, self.b3]
        return ws, bs

    def __call__(self, x, edge_index):
        n = x.shape[0]
        a_hat = build_norm_adj(edge_index, n)
        ws, bs = self.layer_params()
        return fused_gcn_forward(a_hat, x, ws, bs)


if __name__ == "__main__":
    key = jax.random.PRNGKey(0)
    k_x, k_e, k_p = jax.random.split(key, 3)

    num_nodes = 16
    num_edges = 32
    hidden_size = 32

    # node features: [N, 1]  (Net4's conv1 has in_channels = 1)
    x = jax.random.normal(k_x, (num_nodes, 1), jnp.float32)
    # edge_index: [2, E] random directed edges
    edge_index = jax.random.randint(k_e, (2, num_edges), 0, num_nodes,
                                    dtype=jnp.int32)

    model = Net4Pallas(hidden_size, k_p)
    a_hat = build_norm_adj(edge_index, num_nodes)
    ws, bs = model.layer_params()
    ref = _net4_reference(a_hat, x, ws, bs)
    scale = float(jnp.max(jnp.abs(ref))) + 1e-6

    # Resident-A fast path (what __call__ picks for this small graph).
    out = jax.block_until_ready(model(x, edge_index))
    assert out.shape == (num_nodes, 1)
    assert bool(jnp.all(jnp.isfinite(out)))
    err_res = float(jnp.max(jnp.abs(out - ref)))
    assert err_res <= 0.1 * scale + 0.1, f"resident path err={err_res}"

    # Streamed-A path (forced), exercising the tiled-A code path as well.
    out_s = jax.block_until_ready(
        fused_gcn_forward(a_hat, x, ws, bs, force_stream=True))
    assert out_s.shape == (num_nodes, 1)
    assert bool(jnp.all(jnp.isfinite(out_s)))
    err_str = float(jnp.max(jnp.abs(out_s - ref)))
    assert err_str <= 0.1 * scale + 0.1, f"streamed path err={err_str}"

    print("KERNEL_OK")
</pallas_src>

<mosaic_0001>
module attributes {stable_mosaic.version = 11 : i64} {
  func.func @_fused_gcn_kernel(%arg0: i32, %arg1: i32, %arg2: i32, %arg3: memref<128x128xbf16, #tpu.memory_space<vmem>>, %arg4: memref<128x128xbf16, #tpu.memory_space<vmem>>, %arg5: memref<1x128x128xbf16, #tpu.memory_space<vmem>>, %arg6: memref<1x1x128xf32, #tpu.memory_space<vmem>>, %arg7: memref<128x128xf32, #tpu.memory_space<vmem>>, %arg8: memref<128x128xf32, #tpu.memory_space<vmem>>, %arg9: memref<128x128xbf16, #tpu.memory_space<vmem>>, %arg10: memref<128x128xbf16, #tpu.memory_space<vmem>>) attributes {dimension_semantics = [#tpu.dimension_semantics<arbitrary>, #tpu.dimension_semantics<arbitrary>, #tpu.dimension_semantics<arbitrary>], iteration_bounds = array<i64: 4, 1, 1>, scalar_prefetch = 0 : i64, scratch_operands = 3 : i64, tpu.core_type = #tpu.core_type<tc>, window_params = [{pipeline_mode = #tpu.pipeline_mode<synchronous>, transform_indices = @transform_0, window_bounds = array<i64: 128, 128>}, {transform_indices = @transform_1, window_bounds = array<i64: 128, 128>}, {transform_indices = @transform_2, window_bounds = array<i64: 1, 128, 128>}, {transform_indices = @transform_3, window_bounds = array<i64: 1, 1, 128>}, {transform_indices = @transform_4, window_bounds = array<i64: 128, 128>}]} {
    %c128_i32 = arith.constant 128 : i32
    %0 = arith.muli %arg1, %c128_i32 : i32
    %1 = tpu.assume_multiple %0, 128 : i32
    %c128_i32_0 = arith.constant 128 : i32
    %2 = arith.muli %arg2, %c128_i32_0 : i32
    %3 = tpu.assume_multiple %2, 128 : i32
    %c0_i32 = arith.constant 0 : i32
    %4 = arith.cmpi eq, %arg2, %c0_i32 : i32
    %5 = arith.extui %4 : i1 to i32
    %c0_i32_1 = arith.constant 0 : i32
    %6 = arith.cmpi ne, %5, %c0_i32_1 : i32
    scf.if %6 {
      %cst = arith.constant 0.000000e+00 : f32
      %46 = vector.broadcast %cst : f32 to vector<128x128xf32>
      %c0 = arith.constant 0 : index
      %c0_22 = arith.constant 0 : index
      %47 = vector.load %arg8[%c0, %c0_22] : memref<128x128xf32, #tpu.memory_space<vmem>>, vector<128x128xf32>
      tpu.vector_store %arg8[%c0, %c0_22], %46 {strides = array<i32>} : memref<128x128xf32, #tpu.memory_space<vmem>>, vector<128x128xf32>,
    } else {
    }
    %7 = arith.index_cast %1 : i32 to index
    %8 = arith.index_cast %3 : i32 to index
    %9 = vector.load %arg3[%7, %8] : memref<128x128xbf16, #tpu.memory_space<vmem>>, vector<128x128xbf16>
    %c0_i32_2 = arith.constant 0 : i32
    %10 = arith.cmpi eq, %arg0, %c0_i32_2 : i32
    %11 = arith.extui %10 : i1 to i32
    %c0_i32_3 = arith.constant 0 : i32
    %12 = arith.cmpi ne, %11, %c0_i32_3 : i32
    scf.if %12 {
      %c0 = arith.constant 0 : index
      %c0_22 = arith.constant 0 : index
      %46 = vector.load %arg4[%c0, %c0_22] : memref<128x128xbf16, #tpu.memory_space<vmem>>, vector<128x128xbf16>
      %c0_23 = arith.constant 0 : index
      %c0_24 = arith.constant 0 : index
      %47 = vector.load %arg8[%c0_23, %c0_24] : memref<128x128xf32, #tpu.memory_space<vmem>>, vector<128x128xf32>
      %cst = arith.constant dense<0.000000e+00> : vector<128x128xf32>
      %48 = tpu.matmul %9, %46, %cst {dimension_numbers = #tpu.dot_dimension_numbers<[1], [0], [0], [1], [0, 0, 1, 1], [], []>} : vector<128x128xbf16>, vector<128x128xbf16>, vector<128x128xf32> -> vector<128x128xf32>
      %49 = arith.addf %47, %48 : vector<128x128xf32>
      %c0_25 = arith.constant 0 : index
      %c0_26 = arith.constant 0 : index
      %50 = vector.load %arg8[%c0_25, %c0_26] : memref<128x128xf32, #tpu.memory_space<vmem>>, vector<128x128xf32>
      tpu.vector_store %arg8[%c0_25, %c0_26], %49 {strides = array<i32>} : memref<128x128xf32, #tpu.memory_space<vmem>>, vector<128x128xf32>,
    } else {
    }
    %c0_i32_4 = arith.constant 0 : i32
    %13 = arith.cmpi ne, %arg0, %c0_i32_4 : i32
    %c2_i32 = arith.constant 2 : i32
    %c0_i32_5 = arith.constant 0 : i32
    %14 = arith.cmpi eq, %c2_i32, %c0_i32_5 : i32
    %c1_i32 = arith.constant 1 : i32
    %15 = arith.select %14, %c1_i32, %c2_i32 : i32
    %16 = arith.remsi %arg0, %15 : i32
    %c0_i32_6 = arith.constant 0 : i32
    %17 = arith.cmpi ne, %16, %c0_i32_6 : i32
    %c0_i32_7 = arith.constant 0 : i32
    %18 = arith.cmpi slt, %16, %c0_i32_7 : i32
    %c0_i32_8 = arith.constant 0 : i32
    %19 = arith.cmpi slt, %15, %c0_i32_8 : i32
    %20 = arith.xori %18, %19 : i1
    %21 = arith.andi %20, %17 : i1
    %22 = arith.addi %16, %15 : i32
    %23 = arith.select %21, %22, %16 : i32
    %c1_i32_9 = arith.constant 1 : i32
    %24 = arith.cmpi eq, %23, %c1_i32_9 : i32
    %25 = arith.andi %13, %24 : i1
    %26 = arith.extui %25 : i1 to i32
    %c0_i32_10 = arith.constant 0 : i32
    %27 = arith.cmpi ne, %26, %c0_i32_10 : i32
    scf.if %27 {
      %46 = arith.index_cast %3 : i32 to index
      %c0 = arith.constant 0 : index
      %47 = vector.load %arg9[%46, %c0] : memref<128x128xbf16, #tpu.memory_space<vmem>>, vector<128x128xbf16>
      %c0_22 = arith.constant 0 : index
      %c0_23 = arith.constant 0 : index
      %48 = vector.load %arg8[%c0_22, %c0_23] : memref<128x128xf32, #tpu.memory_space<vmem>>, vector<128x128xf32>
      %cst = arith.constant dense<0.000000e+00> : vector<128x128xf32>
      %49 = tpu.matmul %9, %47, %cst {dimension_numbers = #tpu.dot_dimension_numbers<[1], [0], [0], [1], [0, 0, 1, 1], [], []>} : vector<128x128xbf16>, vector<128x128xbf16>, vector<128x128xf32> -> vector<128x128xf32>
      %50 = arith.addf %48, %49 : vector<128x128xf32>
      %c0_24 = arith.constant 0 : index
      %c0_25 = arith.constant 0 : index
      %51 = vector.load %arg8[%c0_24, %c0_25] : memref<128x128xf32, #tpu.memory_space<vmem>>, vector<128x128xf32>
      tpu.vector_store %arg8[%c0_24, %c0_25], %50 {strides = array<i32>} : memref<128x128xf32, #tpu.memory_space<vmem>>, vector<128x128xf32>,
    } else {
    }
    %c0_i32_11 = arith.constant 0 : i32
    %28 = arith.cmpi ne, %arg0, %c0_i32_11 : i32
    %c2_i32_12 = arith.constant 2 : i32
    %c0_i32_13 = arith.constant 0 : i32
    %29 = arith.cmpi eq, %c2_i32_12, %c0_i32_13 : i32
    %c1_i32_14 = arith.constant 1 : i32
    %30 = arith.select %29, %c1_i32_14, %c2_i32_12 : i32
    %31 = arith.remsi %arg0, %30 : i32
    %c0_i32_15 = arith.constant 0 : i32
    %32 = arith.cmpi ne, %31, %c0_i32_15 : i32
    %c0_i32_16 = arith.constant 0 : i32
    %33 = arith.cmpi slt, %31, %c0_i32_16 : i32
    %c0_i32_17 = arith.constant 0 : i32
    %34 = arith.cmpi slt, %30, %c0_i32_17 : i32
    %35 = arith.xori %33, %34 : i1
    %36 = arith.andi %35, %32 : i1
    %37 = arith.addi %31, %30 : i32
    %38 = arith.select %36, %37, %31 : i32
    %c0_i32_18 = arith.constant 0 : i32
    %39 = arith.cmpi eq, %38, %c0_i32_18 : i32
    %40 = arith.andi %28, %39 : i1
    %41 = arith.extui %40 : i1 to i32
    %c0_i32_19 = arith.constant 0 : i32
    %42 = arith.cmpi ne, %41, %c0_i32_19 : i32
    scf.if %42 {
      %46 = arith.index_cast %3 : i32 to index
      %c0 = arith.constant 0 : index
      %47 = vector.load %arg10[%46, %c0] : memref<128x128xbf16, #tpu.memory_space<vmem>>, vector<128x128xbf16>
      %c0_22 = arith.constant 0 : index
      %c0_23 = arith.constant 0 : index
      %48 = vector.load %arg8[%c0_22, %c0_23] : memref<128x128xf32, #tpu.memory_space<vmem>>, vector<128x128xf32>
      %cst = arith.constant dense<0.000000e+00> : vector<128x128xf32>
      %49 = tpu.matmul %9, %47, %cst {dimension_numbers = #tpu.dot_dimension_numbers<[1], [0], [0], [1], [0, 0, 1, 1], [], []>} : vector<128x128xbf16>, vector<128x128xbf16>, vector<128x128xf32> -> vector<128x128xf32>
      %50 = arith.addf %48, %49 : vector<128x128xf32>
      %c0_24 = arith.constant 0 : index
      %c0_25 = arith.constant 0 : index
      %51 = vector.load %arg8[%c0_24, %c0_25] : memref<128x128xf32, #tpu.memory_space<vmem>>, vector<128x128xf32>
      tpu.vector_store %arg8[%c0_24, %c0_25], %50 {strides = array<i32>} : memref<128x128xf32, #tpu.memory_space<vmem>>, vector<128x128xf32>,
    } else {
    }
    %c0_i32_20 = arith.constant 0 : i32
    %43 = arith.cmpi eq, %arg2, %c0_i32_20 : i32
    %44 = arith.extui %43 : i1 to i32
    %c0_i32_21 = arith.constant 0 : i32
    %45 = arith.cmpi ne, %44, %c0_i32_21 : i32
    scf.if %45 {
      %c0 = arith.constant 0 : index
      %c0_22 = arith.constant 0 : index
      %46 = vector.load %arg8[%c0, %c0_22] : memref<128x128xf32, #tpu.memory_space<vmem>>, vector<128x128xf32>
      %47 = arith.truncf %46 : vector<128x128xf32> to vector<128x128xbf16>
      %c0_23 = arith.constant 0 : index
      %c0_24 = arith.constant 0 : index
      %c0_25 = arith.constant 0 : index
      %48 = vector.load %arg5[%c0_23, %c0_24, %c0_25] : memref<1x128x128xbf16, #tpu.memory_space<vmem>>, vector<1x128x128xbf16>
      %49 = vector.shape_cast %48 : vector<1x128x128xbf16> to vector<128x128xbf16>
      %cst = arith.constant dense<0.000000e+00> : vector<128x128xf32>
      %50 = tpu.matmul %47, %49, %cst {dimension_numbers = #tpu.dot_dimension_numbers<[1], [0], [0], [1], [0, 0, 1, 1], [], []>} : vector<128x128xbf16>, vector<128x128xbf16>, vector<128x128xf32> -> vector<128x128xf32>
      %c0_26 = arith.constant 0 : index
      %c0_27 = arith.constant 0 : index
      %c0_28 = arith.constant 0 : index
      %51 = vector.load %arg6[%c0_26, %c0_27, %c0_28] : memref<1x1x128xf32, #tpu.memory_space<vmem>>, vector<1x1x128xf32>
      %52 = vector.shape_cast %51 : vector<1x1x128xf32> to vector<1x128xf32>
      %53 = vector.broadcast %52 : vector<1x128xf32> to vector<128x128xf32>
      %54 = arith.addf %50, %53 : vector<128x128xf32>
      %c3_i32 = arith.constant 3 : i32
      %55 = arith.cmpi slt, %arg0, %c3_i32 : i32
      %56 = arith.extui %55 : i1 to i32
      %c0_i32_29 = arith.constant 0 : i32
      %57 = arith.cmpi ne, %56, %c0_i32_29 : i32
      scf.if %57 {
        %cst_32 = arith.constant 0.000000e+00 : f32
        %61 = vector.broadcast %cst_32 : f32 to vector<128x128xf32>
        %62 = arith.maximumf %54, %61 : vector<128x128xf32>
        %63 = arith.truncf %62 : vector<128x128xf32> to vector<128x128xbf16>
        %c2_i32_33 = arith.constant 2 : i32
        %c0_i32_34 = arith.constant 0 : i32
        %64 = arith.cmpi eq, %c2_i32_33, %c0_i32_34 : i32
        %c1_i32_35 = arith.constant 1 : i32
        %65 = arith.select %64, %c1_i32_35, %c2_i32_33 : i32
        %66 = arith.remsi %arg0, %65 : i32
        %c0_i32_36 = arith.constant 0 : i32
        %67 = arith.cmpi ne, %66, %c0_i32_36 : i32
        %c0_i32_37 = arith.constant 0 : i32
        %68 = arith.cmpi slt, %66, %c0_i32_37 : i32
        %c0_i32_38 = arith.constant 0 : i32
        %69 = arith.cmpi slt, %65, %c0_i32_38 : i32
        %70 = arith.xori %68, %69 : i1
        %71 = arith.andi %70, %67 : i1
        %72 = arith.addi %66, %65 : i32
        %73 = arith.select %71, %72, %66 : i32
        %c0_i32_39 = arith.constant 0 : i32
        %74 = arith.cmpi eq, %73, %c0_i32_39 : i32
        %75 = arith.extui %74 : i1 to i32
        %c0_i32_40 = arith.constant 0 : i32
        %76 = arith.cmpi ne, %75, %c0_i32_40 : i32
        scf.if %76 {
          %90 = arith.index_cast %1 : i32 to index
          %c0_49 = arith.constant 0 : index
          %91 = vector.load %arg9[%90, %c0_49] : memref<128x128xbf16, #tpu.memory_space<vmem>>, vector<128x128xbf16>
          tpu.vector_store %arg9[%90, %c0_49], %63 {strides = array<i32>} : memref<128x128xbf16, #tpu.memory_space<vmem>>, vector<128x128xbf16>,
        } else {
        }
        %c2_i32_41 = arith.constant 2 : i32
        %c0_i32_42 = arith.constant 0 : i32
        %77 = arith.cmpi eq, %c2_i32_41, %c0_i32_42 : i32
        %c1_i32_43 = arith.constant 1 : i32
        %78 = arith.select %77, %c1_i32_43, %c2_i32_41 : i32
        %79 = arith.remsi %arg0, %78 : i32
        %c0_i32_44 = arith.constant 0 : i32
        %80 = arith.cmpi ne, %79, %c0_i32_44 : i32
        %c0_i32_45 = arith.constant 0 : i32
        %81 = arith.cmpi slt, %79, %c0_i32_45 : i32
        %c0_i32_46 = arith.constant 0 : i32
        %82 = arith.cmpi slt, %78, %c0_i32_46 : i32
        %83 = arith.xori %81, %82 : i1
        %84 = arith.andi %83, %80 : i1
        %85 = arith.addi %79, %78 : i32
        %86 = arith.select %84, %85, %79 : i32
        %c1_i32_47 = arith.constant 1 : i32
        %87 = arith.cmpi eq, %86, %c1_i32_47 : i32
        %88 = arith.extui %87 : i1 to i32
        %c0_i32_48 = arith.constant 0 : i32
        %89 = arith.cmpi ne, %88, %c0_i32_48 : i32
        scf.if %89 {
          %90 = arith.index_cast %1 : i32 to index
          %c0_49 = arith.constant 0 : index
          %91 = vector.load %arg10[%90, %c0_49] : memref<128x128xbf16, #tpu.memory_space<vmem>>, vector<128x128xbf16>
          tpu.vector_store %arg10[%90, %c0_49], %63 {strides = array<i32>} : memref<128x128xbf16, #tpu.memory_space<vmem>>, vector<128x128xbf16>,
        } else {
        }
      } else {
      }
      %c3_i32_30 = arith.constant 3 : i32
      %58 = arith.cmpi eq, %arg0, %c3_i32_30 : i32
      %59 = arith.extui %58 : i1 to i32
      %c0_i32_31 = arith.constant 0 : i32
      %60 = arith.cmpi ne, %59, %c0_i32_31 : i32
      scf.if %60 {
        %c0_32 = arith.constant 0 : index
        %c0_33 = arith.constant 0 : index
        %61 = vector.load %arg7[%c0_32, %c0_33] : memref<128x128xf32, #tpu.memory_space<vmem>>, vector<128x128xf32>
        tpu.vector_store %arg7[%c0_32, %c0_33], %54 {strides = array<i32>} : memref<128x128xf32, #tpu.memory_space<vmem>>, vector<128x128xf32>,
      } else {
      }
    } else {
    }
    return
  }
  func.func @transform_0(%arg0: i32, %arg1: i32, %arg2: i32) -> (i32, i32) {
    %c0_i32 = arith.constant 0 : i32
    %c0_i32_0 = arith.constant 0 : i32
    %c0_i32_1 = arith.constant 0 : i32
    return %c0_i32, %c0_i32_0 : i32, i32
  }
  func.func @transform_1(%arg0: i32, %arg1: i32, %arg2: i32) -> (i32, i32) {
    %c0_i32 = arith.constant 0 : i32
    %0 = arith.cmpi eq, %arg0, %c0_i32 : i32
    %c0_i32_0 = arith.constant 0 : i32
    %1 = arith.select %0, %arg2, %c0_i32_0 : i32
    %c0_i32_1 = arith.constant 0 : i32
    %c0_i32_2 = arith.constant 0 : i32
    return %1, %c0_i32_1 : i32, i32
  }
  func.func @transform_2(%arg0: i32, %arg1: i32, %arg2: i32) -> (i32, i32, i32) {
    %c0_i32 = arith.constant 0 : i32
    %c0_i32_0 = arith.constant 0 : i32
    %c0_i32_1 = arith.constant 0 : i32
    return %arg0, %c0_i32, %c0_i32_0 : i32, i32, i32
  }
  func.func @transform_3(%arg0: i32, %arg1: i32, %arg2: i32) -> (i32, i32, i32) {
    %c0_i32 = arith.constant 0 : i32
    %c0_i32_0 = arith.constant 0 : i32
    %c0_i32_1 = arith.constant 0 : i32
    return %arg0, %c0_i32, %c0_i32_0 : i32, i32, i32
  }
  func.func @transform_4(%arg0: i32, %arg1: i32, %arg2: i32) -> (i32, i32) {
    %c3_i32 = arith.constant 3 : i32
    %0 = arith.cmpi eq, %arg0, %c3_i32 : i32
    %c0_i32 = arith.constant 0 : i32
    %1 = arith.select %0, %arg1, %c0_i32 : i32
    %c0_i32_0 = arith.constant 0 : i32
    %c0_i32_1 = arith.constant 0 : i32
    return %1, %c0_i32_0 : i32, i32
  }
}

</mosaic_0001>

<bundles_post_ra>
// kernel: tpu_custom_call.1
= control target key start
LH: loop header
LB: loop body
LE: loop exit
PB: predicated region body
PF: predicated region fallthrough
CT: control target
= control target key end

     0   :  { %9 = vsyncpa [#allocation6], 0  ;;  %s2535_s0 = inlined_call_operand.hbm [shape: bf16[128,128], index: 0, kind: input, shape index: {}]   ;;  %s2536_s1 = inlined_call_operand.hbm [shape: bf16[128,128], index: 1, kind: input, shape index: {}]   ;;  %s2537_s2 = inlined_call_operand.hbm [shape: bf16[4,128,128], index: 2, kind: input, shape index: {}]   ;;  %s2538_s3 = inlined_call_operand.vmem [shape: f32[4,1,128], index: 3, kind: input, shape index: {}]   ;;  %s2539_s4 = inlined_call_operand.hbm [shape: f32[128,128], index: 4, kind: output, shape index: {}]  }
   0x1   :  { %10 = vsyncpa [#allocation9], 0 }
   0x2   :  { %12 = vsyncpa [#allocation9 + $0x1], 0 }
   0x3   :  { %13 = vsyncpa [#allocation7], 0 }
   0x4   :  { %15 = vsyncpa [#allocation7 + $0x1], 0  ;;  %s2124_s15 = smov 0   ;;  %s2126_s16 = smov 0  }
   0x5   :  { %s2128_s17 = smov 0   ;;  %s2130_s18 = smov 0  }
   0x6   :  { %s2132_s19 = smov 0   ;;  %s2134_s20 = smov 0  }
   0x7 LB: > { %p2541_p0 = scmp.eq.s32.totalorder %s2088_s20, 0  ;;  %p2540_p1 = scmp.lt.s32.totalorder %s2088_s20, 4  ;;  %s2088_s20 = sphi %s2134_s20, %s21_s20   ;;  %s2084_s19 = sphi %s2132_s19, %s2567_s19   ;;  %s2080_s18 = sphi %s2130_s18, %s2566_s18   ;;  %s2076_s17 = sphi %s2128_s17, %s2565_s17   ;;  %s2072_s16 = sphi %s2126_s16, %s2564_s16   ;;  %s2068_s15 = sphi %s2124_s15, %s2563_s15  }
   0x8   : > { %s204_s22 = sand.u32 1, %s2088_s20   ;;  %s2090_s23 = smov [#allocation8]  }
   0x9   : > { %s217_s24 = sshll.u32 %s2090_s23, 4  ;;  %p2162_p2 = pnand %p2540_p1, %p2541_p0  ;;  %s218_s24 = int_to_ptr.vmem [resolvable:$true] %s217_s24 }
   0xa   : > { %s2166_s26 = scalar_lea.sflag [#allocation9], %s204_s22  ;;  %s1914_s29 = scalar_lea.hbm %s2536_s1, 1024 }
   0xb   : > { %p1915_p3 = scmp.ne.s32.totalorder %s2536_s1, %s1914_s29  ;;  %p1916_p4 = pneg %p2162_p2 }
   0xc   : > { %p1921_p7 = scmp.lt.u32.totalorder %s1914_s29, %s2536_s1 }
   0xd   : > { %p1917_p5 = pnand %p1916_p4, %p1915_p3 }
   0xf   : > { %p1918_p6 = pneg %p1917_p5 }
  0x11   : > { %p1923_p8 = pnand %p1921_p7, %p1918_p6 }
  0x13   : > { %1926 = shalt.err (!%p1923_p8)
}
  0x14   : > { %s1927_s8 = scalar_lea.vmem %s218_s24, 1024  ;;  %s1934_s9 = scalar_lea.vmem %s218_s24, 2048 }
  0x15   : > { %p1928_p9 = scmp.ne.s32.totalorder %s218_s24, %s1927_s8  ;;  %p1935_p12 = scmp.lt.s32.totalorder %s218_s24, %s218_s24 }
  0x16   : > { %p1936_p13 = scmp.lt.s32.totalorder %s1934_s9, %s1927_s8 }
  0x17   : > { %p1930_p10 = pnand %p1928_p9, %p1916_p4 }
  0x18   : > { %p1937_p1 = por %p1936_p13, %p1935_p12 }
  0x19   : > { %p1931_p11 = pneg %p1930_p10 }
  0x1b   : > { %p1938_p0 = pnand %p1937_p1, %p1931_p11 }
  0x1d   : > { %1941 = shalt.err (!%p1938_p0)
}
  0x1e   : > { %s2091_s10 = smov 64   ;;  %s2092_s11 = smov 4  }
  0x1f   : > { %1826 = dma.hbm_to_vmem [thread:$0]  (!%p2162_p2), %s2536_s1, 1024, %s218_s24, %s2166_s26, %s2091_s10, %s2091_s10, %s2092_s11  }
  0x20   : > { %s2189_s14 = sadd.s32 4294967295, %s2088_s20   ;;  %p105_p0 = scmp.ne.s32.totalorder %s2076_s17, %s2072_s16 }
  0x21   : > { %p111_p1 = scmp.ne.s32.totalorder %s2072_s16, %s2068_s15  ;;  %p2542_p3 = scmp.eq.s32.totalorder %s2189_s14, 0 }
  0x22   : > { %p2547_p4 = scmp.eq.s32.totalorder %s2088_s20, 0  ;;  %p1484_p6 = scmp.ge.s32.totalorder %s2088_s20, 1 }
  0x23   : > { %p2201_p7 = por %p2542_p3, %p111_p1  ;;  %p178_p2 = scmp.lt.s32.totalorder %s2088_s20, 5 }
  0x24   : > { %p107_p5 = por %p2547_p4, %p105_p0  ;;  %s2093_s24 = smov [#allocation5]  }
  0x25   : > { %s2548_s22 = scalar_select %p2201_p7, 1, 0 }
  0x26   : > { %p2206_p8 = pnand %p1484_p6, %p178_p2  ;;  %s190_s25 = sshll.u32 %s2093_s24, 4  ;;  %s191_s25 = int_to_ptr.vmem [resolvable:$true] %s190_s25 }
  0x27   : > { %p2550_p9 = scmp.lt.s32.totalorder %s2088_s20, 4  ;;  %s40_s28 = sadd.s32 1, %s2084_s19 }
  0x28   : > { %s2549_s23 = scalar_select %p2206_p8, 1, 0 }
  0x29   : > { %p2212_p10 = pnand %p2550_p9, %p107_p5  ;;  %p1819_p11 = pneg %p2206_p8 }
  0x2a   : > { %p2225_p13 = scmp.ge.s32.totalorder %s40_s28, 4  ;;  %s98_s30 = sadd.s32 1, %s2076_s17 }
  0x2b   : > { %s2551_s15 = scalar_select %p2212_p10, 1, 0 }
  0x2c   : > { %p2220_p12 = pnand %p1819_p11, %p2542_p3  ;;  %s229_s5 = sand.u32 1, %s2076_s17  }
  0x2d   : > { %s2553_s29 = scalar_select %p2225_p13, 1, 0 }
  0x2e   : > { %s1942_s8 = scalar_lea.hbm %s2535_s0, 1024  ;;  %p1944_p1 = pneg %p2220_p12 }
  0x2f   : > { %p1943_p0 = scmp.ne.s32.totalorder %s2535_s0, %s1942_s8  ;;  %p1949_p6 = scmp.lt.u32.totalorder %s1942_s8, %s2535_s0 }
  0x31   : > { %p1945_p4 = pnand %p1944_p1, %p1943_p0 }
  0x33   : > { %p1946_p5 = pneg %p1945_p4 }
  0x35   : > { %p1951_p2 = pnand %p1949_p6, %p1946_p5 }
  0x37   : > { %1954 = shalt.err (!%p1951_p2)
}
  0x38   : > { %s1955_s21 = scalar_lea.vmem %s191_s25, 1024  ;;  %p1963_p7 = scmp.lt.s32.totalorder %s191_s25, %s191_s25 }
  0x39   : > { %p1956_p9 = scmp.ne.s32.totalorder %s191_s25, %s1955_s21  ;;  %p1964_p8 = scmp.lt.s32.totalorder %s1955_s21, %s1955_s21 }
  0x3b   : > { %p1958_p11 = pnand %p1956_p9, %p1944_p1  ;;  %p1965_p10 = por %p1964_p8, %p1963_p7 }
  0x3d   : > { %p1959_p3 = pneg %p1958_p11 }
  0x3f   : > { %p1966_p13 = pnand %p1965_p10, %p1959_p3 }
  0x41   : > { %1969 = shalt.err (!%p1966_p13)
}
  0x42   : > { %1822 = dma.hbm_to_vmem [thread:$0]  (!%p2220_p12), %s2535_s0, 1024, %s191_s25, [#allocation6], %s2091_s10, %s2091_s10, %s2092_s11  }
  0x43   : > { %p2554_p0 = scmp.ne.s32.totalorder %s2553_s29, 0  ;;  %s1488_s21 = sshll.u32 %s229_s5, 6 }
  0x44   : > { %s1548_s8 = sshll.u32 %s2084_s19, 10  ;;  %s231_s24 = scalar_lea.vmem [#allocation10], %s1488_s21 }
  0x45   : > { %s2569_s28 = smov (%p2554_p0, %s40_s28), 0  ;;  %s2260_s13 = scalar_lea.hbm %s2537_s2, %s1548_s8 }
  0x46   : > { %s95_s27 = ssub.s32 %s2084_s19, %s2569_s28  ;;  %s238_s6 = sshll.u32 %s231_s24, 4  ;;  %s2265_s6 = int_to_ptr.vmem [resolvable:$true] %s238_s6 }
  0x47   : > { %p96_p3 = scmp.eq.s32.totalorder %s95_s27, 0  ;;  %s1970_s29 = scalar_lea.hbm %s2260_s13, 1024 }
  0x48   : > { %p1971_p7 = scmp.ne.s32.totalorder %s2260_s13, %s1970_s29  ;;  %p2555_p8 = scmp.ne.s32.totalorder %s2551_s15, 0 }
  0x49   : > { %s2263_s25 = scalar_select %p96_p3, %s2076_s17, %s98_s30  }
  0x4a   : > { %p1972_p10 = pneg %p2555_p8  ;;  %s1975_s8 = scalar_lea.hbm %s2537_s2, 4096 }
  0x4b   : > { %p1976_p1 = scmp.lt.u32.totalorder %s2260_s13, %s2537_s2  ;;  %p1977_p4 = scmp.lt.u32.totalorder %s1975_s8, %s1970_s29 }
  0x4c   : > { %p1973_p12 = pnand %p1972_p10, %p1971_p7  ;;  %p1979_p6 = scmp.lt.u32.totalorder %s1970_s29, %s2260_s13 }
  0x4d   : > { %p1978_p5 = por %p1977_p4, %p1976_p1 }
  0x4e   : > { %p1974_p13 = pneg %p1973_p12 }
  0x4f   : > { %p1980_p2 = por %p1979_p6, %p1978_p5 }
  0x51   : > { %p1981_p9 = pnand %p1980_p2, %p1974_p13 }
  0x53   : > { %1984 = shalt.err (!%p1981_p9)
}
  0x54   : > { %s1985_s30 = scalar_lea.vmem %s2265_s6, 1024  ;;  %s2094_s21 = smov [#allocation10]  }
  0x55   : > { %p1986_p11 = scmp.ne.s32.totalorder %s2265_s6, %s1985_s30  ;;  %s1990_s12 = sshll.u32 %s2094_s21, 4  ;;  %s1991_s12 = int_to_ptr.vmem [resolvable:$false] %s1990_s12 }
  0x56   : > { %s1992_s24 = scalar_lea.vmem %s1991_s12, 2048  ;;  %p1993_p7 = scmp.lt.s32.totalorder %s2265_s6, %s1991_s12 }
  0x57   : > { %p1988_p0 = pnand %p1986_p11, %p1972_p10  ;;  %p1994_p12 = scmp.lt.s32.totalorder %s1992_s24, %s1985_s30 }
  0x59   : > { %p1989_p3 = pneg %p1988_p0  ;;  %p1995_p1 = por %p1994_p12, %p1993_p7 }
  0x5b   : > { %p1996_p4 = pnand %p1995_p1, %p1989_p3 }
  0x5d   : > { %1999 = shalt.err (!%p1996_p4)
}
  0x5e   : > { %1829 = dma.hbm_to_vmem [thread:$0]  (!%p2555_p8), %s2260_s13, 1024, %s2265_s6, %s2166_s26, %s2091_s10, %s2091_s10, %s2092_s11  }
  0x5f   : > { %p2556_p10 = scmp.ne.s32.totalorder %s2549_s23, 0 }
  0x60   : > { %p2557_p13 = scmp.eq.s32.totalorder (!%p2556_p10), %s2189_s14, 0 }
  0x61   : > { %256 = sbr.rel (%p2556_p10) target bundleno = 1219 (0x4c3), region = 36 }
  0x68   : > { %2051 = dma.done.wait (%p2557_p13), [#allocation6], 1024   ;;  %p2558_p5 = pmov %p2557_p13 }
  0x69   : > { %s262_s29 = sand.u32 1, %s2189_s14  }
  0x6a   : > { %2053 = vsyncadd (%p2558_p5), [#allocation6], 4294966272  ;;  %s263_s15 = scalar_lea.sflag [#allocation9], %s262_s29  ;;  %p2559_p6 = pmov %p2558_p5 }
  0x6b   : > { %p2560_p2 = pmov %p2558_p5 }
  0x6c   : > { %2055 = dma.done.wait (%p2559_p6), %s263_s15, 1024  }
  0x6d   : > { %2057 = vsyncadd (%p2560_p2), %s263_s15, 4294966272  ;;  %s273_s26 = sand.u32 1, %s2072_s16   ;;  %p2561_p8 = scmp.ne.s32.totalorder %s2548_s22, 0 }
  0x6e   : > { %s1494_s10 = sshll.u32 %s273_s26, 6 }
  0x6f   : > { %s2308_s11 = scalar_lea.vmem [#allocation10], %s1494_s10 }
  0x70   : > { %2059 = dma.done.wait (%p2561_p8), %s263_s15, 1024  }
  0x71   : > { %2061 = vsyncadd (%p2561_p8), %s263_s15, 4294966272  ;;  %p311_p9 = scmp.lt.s32.totalorder %s2080_s18, 3  ;;  %v2095_v0 = vmov 0.0   ;;  %v2324_v1 = vld [vmem:[#allocation5] sm:$0xf]  ;;  %p1495_p11 = scmp.ne.s32.totalorder %s2080_s18, 0 }
  0x72   : > { %324 = vst [vmem:[#allocation2] sm:$0xff] %v2095_v0  ;;  %325 = vst [vmem:[#allocation2 + $0x8] sm:$0xff] %v2095_v0  ;;  %v2326_v2 = vld [vmem:[#allocation5 + $0x4] sm:$0xf]  ;;  %v2328_v3 = vld [vmem:[#allocation5 + $0x8] sm:$0xf] }
  0x73   : > { %326 = vst [vmem:[#allocation2 + $0x10] sm:$0xff] %v2095_v0  ;;  %327 = vst [vmem:[#allocation2 + $0x18] sm:$0xff] %v2095_v0  ;;  %s2318_s22 = scalar_select %p311_p9, %s2080_s18, 3  ;;  %v2330_v4 = vld [vmem:[#allocation5 + $0xc] sm:$0xf] }
  0x74   : > { %328 = vst [vmem:[#allocation2 + $0x20] sm:$0xff] %v2095_v0  ;;  %329 = vst [vmem:[#allocation2 + $0x28] sm:$0xff] %v2095_v0  ;;  %v2332_v5 = vld [vmem:[#allocation5 + $0x10] sm:$0xf]  ;;  %v2334_v6 = vld [vmem:[#allocation5 + $0x14] sm:$0xf]  ;;  %v1496_v19 = vcombine.low (!%p1495_p11), %v2324_v1, %v2326_v2  ;;  %v1497_v27 = vcombine.low (!%p1495_p11), %v2328_v3, %v2330_v4 }
  0x75   : > { %330 = vst [vmem:[#allocation2 + $0x30] sm:$0xff] %v2095_v0  ;;  %331 = vst [vmem:[#allocation2 + $0x38] sm:$0xff] %v2095_v0  ;;  %s313_s6 = scalar_lea.vmem %s2538_s3, %s2318_s22  ;;  %v2336_v7 = vld [vmem:[#allocation5 + $0x18] sm:$0xf]  ;;  %v2338_v8 = vld [vmem:[#allocation5 + $0x1c] sm:$0xf]  ;;  %v1498_v29 = vcombine.low (!%p1495_p11), %v2332_v5, %v2334_v6 }
  0x76   : > { %332 = vst [vmem:[#allocation2 + $0x40] sm:$0xff] %v2095_v0  ;;  %333 = vst [vmem:[#allocation2 + $0x48] sm:$0xff] %v2095_v0  ;;  %v2340_v9 = vld [vmem:[#allocation5 + $0x20] sm:$0xf]  ;;  %v2342_v10 = vld [vmem:[#allocation5 + $0x24] sm:$0xf]  ;;  %1629 = vmatprep.mubr.bf16.mxu0 (!%p1495_p11), %v1496_v19  ;;  %v1499_v31 = vcombine.low (!%p1495_p11), %v2336_v7, %v2338_v8 }
  0x77   : > { %334 = vst [vmem:[#allocation2 + $0x50] sm:$0xff] %v2095_v0  ;;  %335 = vst [vmem:[#allocation2 + $0x58] sm:$0xff] %v2095_v0  ;;  %v2344_v11 = vld [vmem:[#allocation5 + $0x28] sm:$0xf]  ;;  %v2346_v12 = vld [vmem:[#allocation5 + $0x2c] sm:$0xf]  ;;  %v1500_v20 = vcombine.low (!%p1495_p11), %v2340_v9, %v2342_v10 }
  0x78   : > { %336 = vst [vmem:[#allocation2 + $0x60] sm:$0xff] %v2095_v0  ;;  %337 = vst [vmem:[#allocation2 + $0x68] sm:$0xff] %v2095_v0  ;;  %v2348_v13 = vld [vmem:[#allocation5 + $0x30] sm:$0xf]  ;;  %v2350_v14 = vld [vmem:[#allocation5 + $0x34] sm:$0xf]  ;;  %v1501_v28 = vcombine.low (!%p1495_p11), %v2344_v11, %v2346_v12 }
  0x79   : > { %338 = vst [vmem:[#allocation2 + $0x70] sm:$0xff] %v2095_v0  ;;  %339 = vst [vmem:[#allocation2 + $0x78] sm:$0xff] %v2095_v0  ;;  %v2352_v15 = vld [vmem:[#allocation5 + $0x38] sm:$0xf]  ;;  %v2354_v16 = vld [vmem:[#allocation5 + $0x3c] sm:$0xf]  ;;  %1637 = vmatprep.mubr.bf16.mxu1 (!%p1495_p11), %v1500_v20  ;;  %v1502_v30 = vcombine.low (!%p1495_p11), %v2348_v13, %v2350_v14 }
  0x7a   : > { %366 = sbr.rel (%p1495_p11) target bundleno = 381 (0x17d), region = 56  ;;  %v1898_v17 = vld [vmem:[#allocation8] sm:$0xff] (!%p1495_p11)   ;;  %v1899_v18 = vld [vmem:[#allocation8 + $0x8] sm:$0xff] (!%p1495_p11)   ;;  %v1900_v21 = vld [vmem:[#allocation8 + $0x10] sm:$0xff] (!%p1495_p11)   ;;  %v1503_v32 = vcombine.low (!%p1495_p11), %v2352_v15, %v2354_v16 }
  0x7b   : > { %1613 = vmatprep.subr.bf16.mxu0 (!%p1495_p11), %v1898_v17  ;;  %1741 = vmatprep.subr.bf16.mxu1 (!%p1495_p11), %v1898_v17  ;;  %v1901_v22 = vld [vmem:[#allocation8 + $0x18] sm:$0xff] (!%p1495_p11)   ;;  %v1902_v23 = vld [vmem:[#allocation8 + $0x20] sm:$0xff] (!%p1495_p11)   ;;  %v1903_v24 = vld [vmem:[#allocation8 + $0x28] sm:$0xff] (!%p1495_p11)  }
  0x7c   : > { %1614 = vmatpush3.bf16.msra.mxu0 (!%p1495_p11), %v1898_v17  ;;  %1749 = vmatpush3.bf16.msra.mxu1 (!%p1495_p11), %v1898_v17  ;;  %v1904_v25 = vld [vmem:[#allocation8 + $0x30] sm:$0xff] (!%p1495_p11)   ;;  %v1905_v26 = vld [vmem:[#allocation8 + $0x38] sm:$0xff] (!%p1495_p11)   ;;  %v383_v35 = vld [vmem:[#allocation2] sm:$0xff] (!%p1495_p11) }
  0x7d   : > { %1615 = vmatprep.subr.bf16.mxu0 (!%p1495_p11), %v1899_v18  ;;  %1742 = vmatprep.subr.bf16.mxu1 (!%p1495_p11), %v1899_v18  ;;  %v385_v33 = vld [vmem:[#allocation2 + $0x10] sm:$0xff] (!%p1495_p11)  ;;  %v391_v36 = vld [vmem:[#allocation2 + $0x40] sm:$0xff] (!%p1495_p11)  ;;  %v386_v39 = vld [vmem:[#allocation2 + $0x18] sm:$0xff] (!%p1495_p11) }
  0x7e   : > { %v393_v34 = vld [vmem:[#allocation2 + $0x50] sm:$0xff] (!%p1495_p11)  ;;  %v394_v40 = vld [vmem:[#allocation2 + $0x58] sm:$0xff] (!%p1495_p11)  ;;  %v384_v45 = vld [vmem:[#allocation2 + $0x8] sm:$0xff] (!%p1495_p11) }
  0x7f   : > { %v392_v46 = vld [vmem:[#allocation2 + $0x48] sm:$0xff] (!%p1495_p11)  ;;  %v389_v57 = vld [vmem:[#allocation2 + $0x30] sm:$0xff] (!%p1495_p11)  ;;  %v387_v59 = vld [vmem:[#allocation2 + $0x20] sm:$0xff] (!%p1495_p11) }
  0x80   : > { %1616 = vmatpush3.bf16.msra.mxu0 (!%p1495_p11), %v1899_v18  ;;  %1750 = vmatpush3.bf16.msra.mxu1 (!%p1495_p11), %v1899_v18  ;;  %v397_v58 = vld [vmem:[#allocation2 + $0x70] sm:$0xff] (!%p1495_p11)  ;;  %v395_v60 = vld [vmem:[#allocation2 + $0x60] sm:$0xff] (!%p1495_p11)  ;;  %v390_v63 = vld [vmem:[#allocation2 + $0x38] sm:$0xff] (!%p1495_p11) }
  0x81   : > { %1617 = vmatprep.subr.bf16.mxu0 %v1900_v21  ;;  %1743 = vmatprep.subr.bf16.mxu1 %v1900_v21  ;;  %v398_v0 = vld [vmem:[#allocation2 + $0x78] sm:$0xff] }
  0x84   : > { %1618 = vmatpush3.bf16.msra.mxu0 %v1900_v21  ;;  %1751 = vmatpush3.bf16.msra.mxu1 %v1900_v21  ;;  %v388_v21 = vld [vmem:[#allocation2 + $0x28] sm:$0xff] }
  0x85   : > { %1619 = vmatprep.subr.bf16.mxu0 %v1901_v22  ;;  %1744 = vmatprep.subr.bf16.mxu1 %v1901_v22 }
  0x88   : > { %1620 = vmatpush3.bf16.msra.mxu0 %v1901_v22  ;;  %1752 = vmatpush3.bf16.msra.mxu1 %v1901_v22  ;;  %v396_v22 = vld [vmem:[#allocation2 + $0x68] sm:$0xff] }
  0x89   : > { %1621 = vmatprep.subr.bf16.mxu0 %v1902_v23  ;;  %1745 = vmatprep.subr.bf16.mxu1 %v1902_v23 }
  0x8c   : > { %1622 = vmatpush3.bf16.msra.mxu0 %v1902_v23  ;;  %1753 = vmatpush3.bf16.msra.mxu1 %v1902_v23 }
  0x8d   : > { %1623 = vmatprep.subr.bf16.mxu0 %v1903_v24  ;;  %1746 = vmatprep.subr.bf16.mxu1 %v1903_v24 }
  0x90   : > { %1624 = vmatpush3.bf16.msra.mxu0 %v1903_v24  ;;  %1754 = vmatpush3.bf16.msra.mxu1 %v1903_v24 }
  0x91   : > { %1625 = vmatprep.subr.bf16.mxu0 %v1904_v25  ;;  %1747 = vmatprep.subr.bf16.mxu1 %v1904_v25 }
  0x94   : > { %1626 = vmatpush3.bf16.msra.mxu0 %v1904_v25  ;;  %1755 = vmatpush3.bf16.msra.mxu1 %v1904_v25 }
  0x95   : > { %1627 = vmatprep.subr.bf16.mxu0 %v1905_v26  ;;  %1748 = vmatprep.subr.bf16.mxu1 %v1905_v26 }
  0x98   : > { %1628 = vmatpush3.bf16.msra.mxu0 %v1905_v26  ;;  %1756 = vmatpush3.bf16.msra.mxu1 %v1905_v26 }
  0x9b   : > { %1630 = vmatmul.mubr.bf16.vlgmr.msra.gmra.mrb[0].mxu0 %v1497_v27  ;;  %1638 = vmatmul.mubr.bf16.vlgmr.msra.gmra.mrb[0].mxu1 %v1501_v28 }
  0x9c   : > { %1633 = vmatprep.mubr.bf16.mxu0 %v1498_v29  ;;  %1641 = vmatprep.mubr.bf16.mxu1 %v1502_v30 }
  0xa3   : > { %1634 = vmatmul.mubr.bf16.gmra.mrb[4].mxu0 %v1499_v31  ;;  %1642 = vmatmul.mubr.bf16.gmra.mrb[4].mxu1 %v1503_v32 }
 0x16e   : > { %v1631_v37 = vpop.f32.mrb[0].mxu0  ;;  %v1639_v38 = vpop.f32.mrb[0].mxu1 }
 0x16f   : > { %v594_v41 = vadd.f32 %v1631_v37, %v385_v33  ;;  %v602_v42 = vadd.f32 %v1639_v38, %v393_v34  ;;  %v529_v43 = vpop.f32.mrb[1].mxu0  ;;  %v561_v44 = vpop.f32.mrb[1].mxu1 }
 0x170   : > { %v592_v47 = vadd.f32 %v529_v43, %v383_v35  ;;  %v600_v48 = vadd.f32 %v561_v44, %v391_v36  ;;  %v1632_v49 = vpop.f32.mrb[2].mxu0  ;;  %v1640_v50 = vpop.f32.mrb[2].mxu1 }
 0x171   : > { %610 = vst [vmem:[#allocation2 + $0x10] sm:$0xff] %v594_v41  ;;  %618 = vst [vmem:[#allocation2 + $0x50] sm:$0xff] %v602_v42  ;;  %v595_v51 = vadd.f32 %v1632_v49, %v386_v39  ;;  %v603_v52 = vadd.f32 %v1640_v50, %v394_v40  ;;  %v532_v53 = vpop.f32.mrb[3].mxu0  ;;  %v564_v54 = vpop.f32.mrb[3].mxu1 }
 0x172   : > { %608 = vst [vmem:[#allocation2] sm:$0xff] %v592_v47  ;;  %616 = vst [vmem:[#allocation2 + $0x40] sm:$0xff] %v600_v48  ;;  %v593_v55 = vadd.f32 %v532_v53, %v384_v45  ;;  %v601_v56 = vadd.f32 %v564_v54, %v392_v46 }
 0x173   : > { %611 = vst [vmem:[#allocation2 + $0x18] sm:$0xff] %v595_v51  ;;  %619 = vst [vmem:[#allocation2 + $0x58] sm:$0xff] %v603_v52 }
 0x174   : > { %609 = vst [vmem:[#allocation2 + $0x8] sm:$0xff] %v593_v55  ;;  %617 = vst [vmem:[#allocation2 + $0x48] sm:$0xff] %v601_v56 }
 0x176   : > { %v1635_v61 = vpop.f32.mrb[4].mxu0  ;;  %v1643_v62 = vpop.f32.mrb[4].mxu1 }
 0x177   : > { %v598_v17 = vadd.f32 %v1635_v61, %v389_v57  ;;  %v606_v18 = vadd.f32 %v1643_v62, %v397_v58  ;;  %v545_v19 = vpop.f32.mrb[5].mxu0  ;;  %v577_v20 = vpop.f32.mrb[5].mxu1 }
 0x178   : > { %v596_v23 = vadd.f32 %v545_v19, %v387_v59  ;;  %v604_v24 = vadd.f32 %v577_v20, %v395_v60  ;;  %v1636_v25 = vpop.f32.mrb[6].mxu0  ;;  %v1644_v26 = vpop.f32.mrb[6].mxu1 }
 0x179   : > { %614 = vst [vmem:[#allocation2 + $0x30] sm:$0xff] %v598_v17  ;;  %622 = vst [vmem:[#allocation2 + $0x70] sm:$0xff] %v606_v18  ;;  %v599_v27 = vadd.f32 %v1636_v25, %v390_v63  ;;  %v607_v28 = vadd.f32 %v1644_v26, %v398_v0  ;;  %v548_v29 = vpop.f32.mrb[7].mxu0  ;;  %v580_v30 = vpop.f32.mrb[7].mxu1 }
 0x17a   : > { %612 = vst [vmem:[#allocation2 + $0x20] sm:$0xff] %v596_v23  ;;  %620 = vst [vmem:[#allocation2 + $0x60] sm:$0xff] %v604_v24  ;;  %v597_v31 = vadd.f32 %v548_v29, %v388_v21  ;;  %v605_v32 = vadd.f32 %v580_v30, %v396_v22 }
 0x17b   : > { %615 = vst [vmem:[#allocation2 + $0x38] sm:$0xff] %v599_v27  ;;  %623 = vst [vmem:[#allocation2 + $0x78] sm:$0xff] %v607_v28 }
 0x17c   : > { %613 = vst [vmem:[#allocation2 + $0x28] sm:$0xff] %v597_v31  ;;  %621 = vst [vmem:[#allocation2 + $0x68] sm:$0xff] %v605_v32 }
 0x17d PF: > { %p625_p0 = scmp.lt.s32.totalorder %s2080_s18, 0  ;;  %s626_s5 = ssub.s32 0, %s2080_s18 }
 0x17e   : > { %s1512_s7 = smin.u32 %s2080_s18, %s626_s5 }
 0x17f   : > { %s628_s8 = sand.u32 1, %s1512_s7  }
 0x180   : > { %s629_s27 = ssub.s32 0, %s628_s8 }
 0x181   : > { %s2571_s27 = smov (!%p625_p0, %s629_s27), %s628_s8 }
 0x182   : > { %p1514_p3 = scmp.lt.s32.totalorder %s2571_s27, 0  ;;  %s635_s9 = sadd.s32 2, %s2571_s27 }
 0x184   : > { %s2573_s9 = smov (!%p1514_p3, %s635_s9), %s2571_s27 }
 0x185   : > { %p637_p7 = scmp.eq.s32.totalorder %s2573_s9, 1 }
 0x187   : > { %p638_p12 = pnand %p1495_p11, %p637_p7 }
 0x188   : > { %v646_v33 = vld [vmem:[#allocation3] sm:$0xff] (!%p638_p12)  ;;  %v647_v34 = vld [vmem:[#allocation3 + $0x8] sm:$0xff] (!%p638_p12)  ;;  %v1515_v35 = vcombine.low (!%p638_p12), %v2324_v1, %v2326_v2  ;;  %v1519_v36 = vcombine.low (!%p638_p12), %v2340_v9, %v2342_v10  ;;  %v648_v37 = vld [vmem:[#allocation3 + $0x10] sm:$0xff] (!%p638_p12)  ;;  %v1516_v43 = vcombine.low (!%p638_p12), %v2328_v3, %v2330_v4  ;;  %v1520_v44 = vcombine.low (!%p638_p12), %v2344_v11, %v2346_v12 }
 0x189   : > { %641 = sbr.rel (%p638_p12) target bundleno = 651 (0x28b), region = 60  ;;  %1645 = vmatprep.subr.bf16.mxu0 (!%p638_p12), %v646_v33  ;;  %1757 = vmatprep.subr.bf16.mxu1 (!%p638_p12), %v646_v33  ;;  %v649_v38 = vld [vmem:[#allocation3 + $0x18] sm:$0xff] (!%p638_p12)  ;;  %v650_v39 = vld [vmem:[#allocation3 + $0x20] sm:$0xff] (!%p638_p12)  ;;  %v651_v40 = vld [vmem:[#allocation3 + $0x28] sm:$0xff] (!%p638_p12)  ;;  %v1517_v45 = vcombine.low (!%p638_p12), %v2332_v5, %v2334_v6  ;;  %v1521_v46 = vcombine.low (!%p638_p12), %v2348_v13, %v2350_v14  ;;  %v1518_v47 = vcombine.low (!%p638_p12), %v2336_v7, %v2338_v8 }
 0x18a   : > { %1646 = vmatpush3.bf16.msra.mxu0 (!%p638_p12), %v646_v33  ;;  %1765 = vmatpush3.bf16.msra.mxu1 (!%p638_p12), %v646_v33  ;;  %v652_v41 = vld [vmem:[#allocation3 + $0x30] sm:$0xff] (!%p638_p12)  ;;  %v653_v42 = vld [vmem:[#allocation3 + $0x38] sm:$0xff] (!%p638_p12)  ;;  %v1522_v48 = vcombine.low (!%p638_p12), %v2352_v15, %v2354_v16  ;;  %v654_v51 = vld [vmem:[#allocation2] sm:$0xff] (!%p638_p12) }
 0x18b   : > { %1647 = vmatprep.subr.bf16.mxu0 (!%p638_p12), %v647_v34  ;;  %1758 = vmatprep.subr.bf16.mxu1 (!%p638_p12), %v647_v34  ;;  %v656_v49 = vld [vmem:[#allocation2 + $0x10] sm:$0xff] (!%p638_p12)  ;;  %v662_v52 = vld [vmem:[#allocation2 + $0x40] sm:$0xff] (!%p638_p12)  ;;  %v657_v55 = vld [vmem:[#allocation2 + $0x18] sm:$0xff] (!%p638_p12) }
 0x18c   : > { %1661 = vmatprep.mubr.bf16.mxu0 (!%p638_p12), %v1515_v35  ;;  %1669 = vmatprep.mubr.bf16.mxu1 (!%p638_p12), %v1519_v36  ;;  %v664_v50 = vld [vmem:[#allocation2 + $0x50] sm:$0xff] (!%p638_p12)  ;;  %v665_v56 = vld [vmem:[#allocation2 + $0x58] sm:$0xff] (!%p638_p12)  ;;  %v655_v61 = vld [vmem:[#allocation2 + $0x8] sm:$0xff] (!%p638_p12) }
 0x18d   : > { %v663_v62 = vld [vmem:[#allocation2 + $0x48] sm:$0xff] (!%p638_p12)  ;;  %v660_v25 = vld [vmem:[#allocation2 + $0x30] sm:$0xff] (!%p638_p12)  ;;  %v658_v27 = vld [vmem:[#allocation2 + $0x20] sm:$0xff] (!%p638_p12) }
 0x18e   : > { %1648 = vmatpush3.bf16.msra.mxu0 (!%p638_p12), %v647_v34  ;;  %1766 = vmatpush3.bf16.msra.mxu1 (!%p638_p12), %v647_v34  ;;  %v668_v26 = vld [vmem:[#allocation2 + $0x70] sm:$0xff] (!%p638_p12)  ;;  %v666_v28 = vld [vmem:[#allocation2 + $0x60] sm:$0xff] (!%p638_p12)  ;;  %v661_v31 = vld [vmem:[#allocation2 + $0x38] sm:$0xff] (!%p638_p12) }
 0x18f   : > { %1649 = vmatprep.subr.bf16.mxu0 (!%p638_p12), %v648_v37  ;;  %1759 = vmatprep.subr.bf16.mxu1 (!%p638_p12), %v648_v37  ;;  %v669_v32 = vld [vmem:[#allocation2 + $0x78] sm:$0xff] (!%p638_p12) }
 0x192   : > { %1650 = vmatpush3.bf16.msra.mxu0 %v648_v37  ;;  %1767 = vmatpush3.bf16.msra.mxu1 %v648_v37  ;;  %v659_v37 = vld [vmem:[#allocation2 + $0x28] sm:$0xff] }
 0x193   : > { %1651 = vmatprep.subr.bf16.mxu0 %v649_v38  ;;  %1760 = vmatprep.subr.bf16.mxu1 %v649_v38 }
 0x196   : > { %1652 = vmatpush3.bf16.msra.mxu0 %v649_v38  ;;  %1768 = vmatpush3.bf16.msra.mxu1 %v649_v38  ;;  %v667_v38 = vld [vmem:[#allocation2 + $0x68] sm:$0xff] }
 0x197   : > { %1653 = vmatprep.subr.bf16.mxu0 %v650_v39  ;;  %1761 = vmatprep.subr.bf16.mxu1 %v650_v39 }
 0x19a   : > { %1654 = vmatpush3.bf16.msra.mxu0 %v650_v39  ;;  %1769 = vmatpush3.bf16.msra.mxu1 %v650_v39 }
 0x19b   : > { %1655 = vmatprep.subr.bf16.mxu0 %v651_v40  ;;  %1762 = vmatprep.subr.bf16.mxu1 %v651_v40 }
 0x19e   : > { %1656 = vmatpush3.bf16.msra.mxu0 %v651_v40  ;;  %1770 = vmatpush3.bf16.msra.mxu1 %v651_v40 }
 0x19f   : > { %1657 = vmatprep.subr.bf16.mxu0 %v652_v41  ;;  %1763 = vmatprep.subr.bf16.mxu1 %v652_v41 }
 0x1a2   : > { %1658 = vmatpush3.bf16.msra.mxu0 %v652_v41  ;;  %1771 = vmatpush3.bf16.msra.mxu1 %v652_v41 }
 0x1a3   : > { %1659 = vmatprep.subr.bf16.mxu0 %v653_v42  ;;  %1764 = vmatprep.subr.bf16.mxu1 %v653_v42 }
 0x1a6   : > { %1660 = vmatpush3.bf16.msra.mxu0 %v653_v42  ;;  %1772 = vmatpush3.bf16.msra.mxu1 %v653_v42 }
 0x1a9   : > { %1662 = vmatmul.mubr.bf16.vlgmr.msra.gmra.mrb[0].mxu0 %v1516_v43  ;;  %1670 = vmatmul.mubr.bf16.vlgmr.msra.gmra.mrb[0].mxu1 %v1520_v44 }
 0x1aa   : > { %1665 = vmatprep.mubr.bf16.mxu0 %v1517_v45  ;;  %1673 = vmatprep.mubr.bf16.mxu1 %v1521_v46 }
 0x1b1   : > { %1666 = vmatmul.mubr.bf16.gmra.mrb[4].mxu0 %v1518_v47  ;;  %1674 = vmatmul.mubr.bf16.gmra.mrb[4].mxu1 %v1522_v48 }
 0x27c   : > { %v1663_v53 = vpop.f32.mrb[0].mxu0  ;;  %v1671_v54 = vpop.f32.mrb[0].mxu1 }
 0x27d   : > { %v817_v57 = vadd.f32 %v1663_v53, %v656_v49  ;;  %v825_v58 = vadd.f32 %v1671_v54, %v664_v50  ;;  %v752_v59 = vpop.f32.mrb[1].mxu0  ;;  %v784_v60 = vpop.f32.mrb[1].mxu1 }
 0x27e   : > { %v815_v63 = vadd.f32 %v752_v59, %v654_v51  ;;  %v823_v0 = vadd.f32 %v784_v60, %v662_v52  ;;  %v1664_v17 = vpop.f32.mrb[2].mxu0  ;;  %v1672_v18 = vpop.f32.mrb[2].mxu1 }
 0x27f   : > { %833 = vst [vmem:[#allocation2 + $0x10] sm:$0xff] %v817_v57  ;;  %841 = vst [vmem:[#allocation2 + $0x50] sm:$0xff] %v825_v58  ;;  %v818_v19 = vadd.f32 %v1664_v17, %v657_v55  ;;  %v826_v20 = vadd.f32 %v1672_v18, %v665_v56  ;;  %v755_v21 = vpop.f32.mrb[3].mxu0  ;;  %v787_v22 = vpop.f32.mrb[3].mxu1 }
 0x280   : > { %831 = vst [vmem:[#allocation2] sm:$0xff] %v815_v63  ;;  %839 = vst [vmem:[#allocation2 + $0x40] sm:$0xff] %v823_v0  ;;  %v816_v23 = vadd.f32 %v755_v21, %v655_v61  ;;  %v824_v24 = vadd.f32 %v787_v22, %v663_v62 }
 0x281   : > { %834 = vst [vmem:[#allocation2 + $0x18] sm:$0xff] %v818_v19  ;;  %842 = vst [vmem:[#allocation2 + $0x58] sm:$0xff] %v826_v20 }
 0x282   : > { %832 = vst [vmem:[#allocation2 + $0x8] sm:$0xff] %v816_v23  ;;  %840 = vst [vmem:[#allocation2 + $0x48] sm:$0xff] %v824_v24 }
 0x284   : > { %v1667_v29 = vpop.f32.mrb[4].mxu0  ;;  %v1675_v30 = vpop.f32.mrb[4].mxu1 }
 0x285   : > { %v821_v33 = vadd.f32 %v1667_v29, %v660_v25  ;;  %v829_v34 = vadd.f32 %v1675_v30, %v668_v26  ;;  %v768_v35 = vpop.f32.mrb[5].mxu0  ;;  %v800_v36 = vpop.f32.mrb[5].mxu1 }
 0x286   : > { %v819_v39 = vadd.f32 %v768_v35, %v658_v27  ;;  %v827_v40 = vadd.f32 %v800_v36, %v666_v28  ;;  %v1668_v41 = vpop.f32.mrb[6].mxu0  ;;  %v1676_v42 = vpop.f32.mrb[6].mxu1 }
 0x287   : > { %837 = vst [vmem:[#allocation2 + $0x30] sm:$0xff] %v821_v33  ;;  %845 = vst [vmem:[#allocation2 + $0x70] sm:$0xff] %v829_v34  ;;  %v822_v43 = vadd.f32 %v1668_v41, %v661_v31  ;;  %v830_v44 = vadd.f32 %v1676_v42, %v669_v32  ;;  %v771_v45 = vpop.f32.mrb[7].mxu0  ;;  %v803_v46 = vpop.f32.mrb[7].mxu1 }
 0x288   : > { %835 = vst [vmem:[#allocation2 + $0x20] sm:$0xff] %v819_v39  ;;  %843 = vst [vmem:[#allocation2 + $0x60] sm:$0xff] %v827_v40  ;;  %v820_v47 = vadd.f32 %v771_v45, %v659_v37  ;;  %v828_v48 = vadd.f32 %v803_v46, %v667_v38 }
 0x289   : > { %838 = vst [vmem:[#allocation2 + $0x38] sm:$0xff] %v822_v43  ;;  %846 = vst [vmem:[#allocation2 + $0x78] sm:$0xff] %v830_v44 }
 0x28a   : > { %836 = vst [vmem:[#allocation2 + $0x28] sm:$0xff] %v820_v47  ;;  %844 = vst [vmem:[#allocation2 + $0x68] sm:$0xff] %v828_v48 }
 0x28b PF: > { %p847_p1 = scmp.eq.s32.totalorder %s2573_s9, 0 }
 0x28d   : > { %p848_p4 = pnand %p1495_p11, %p847_p1 }
 0x28e   : > { %v856_v49 = vld [vmem:[#allocation4] sm:$0xff] (!%p848_p4)  ;;  %v857_v50 = vld [vmem:[#allocation4 + $0x8] sm:$0xff] (!%p848_p4)  ;;  %v1523_v51 = vcombine.low (!%p848_p4), %v2324_v1, %v2326_v2  ;;  %v1527_v52 = vcombine.low (!%p848_p4), %v2340_v9, %v2342_v10  ;;  %v858_v53 = vld [vmem:[#allocation4 + $0x10] sm:$0xff] (!%p848_p4)  ;;  %v1524_v55 = vcombine.low (!%p848_p4), %v2328_v3, %v2330_v4  ;;  %v1528_v56 = vcombine.low (!%p848_p4), %v2344_v11, %v2346_v12 }
 0x28f   : > { %851 = sbr.rel (%p848_p4) target bundleno = 913 (0x391), region = 64  ;;  %1677 = vmatprep.subr.bf16.mxu0 (!%p848_p4), %v856_v49  ;;  %1773 = vmatprep.subr.bf16.mxu1 (!%p848_p4), %v856_v49  ;;  %v859_v54 = vld [vmem:[#allocation4 + $0x18] sm:$0xff] (!%p848_p4)  ;;  %v860_v1 = vld [vmem:[#allocation4 + $0x20] sm:$0xff] (!%p848_p4)  ;;  %v861_v2 = vld [vmem:[#allocation4 + $0x28] sm:$0xff] (!%p848_p4)  ;;  %v1525_v57 = vcombine.low (!%p848_p4), %v2332_v5, %v2334_v6  ;;  %v1529_v58 = vcombine.low (!%p848_p4), %v2348_v13, %v2350_v14  ;;  %v1526_v59 = vcombine.low (!%p848_p4), %v2336_v7, %v2338_v8 }
 0x290   : > { %1678 = vmatpush3.bf16.msra.mxu0 (!%p848_p4), %v856_v49  ;;  %1781 = vmatpush3.bf16.msra.mxu1 (!%p848_p4), %v856_v49  ;;  %v862_v9 = vld [vmem:[#allocation4 + $0x30] sm:$0xff] (!%p848_p4)  ;;  %v863_v10 = vld [vmem:[#allocation4 + $0x38] sm:$0xff] (!%p848_p4)  ;;  %v1530_v3 = vcombine.low (!%p848_p4), %v2352_v15, %v2354_v16  ;;  %v864_v12 = vld [vmem:[#allocation2] sm:$0xff] (!%p848_p4) }
 0x291   : > { %1679 = vmatprep.subr.bf16.mxu0 (!%p848_p4), %v857_v50  ;;  %1774 = vmatprep.subr.bf16.mxu1 (!%p848_p4), %v857_v50  ;;  %v866_v4 = vld [vmem:[#allocation2 + $0x10] sm:$0xff] (!%p848_p4)  ;;  %v872_v60 = vld [vmem:[#allocation2 + $0x40] sm:$0xff] (!%p848_p4)  ;;  %v867_v61 = vld [vmem:[#allocation2 + $0x18] sm:$0xff] (!%p848_p4) }
 0x292   : > { %1693 = vmatprep.mubr.bf16.mxu0 (!%p848_p4), %v1523_v51  ;;  %1701 = vmatprep.mubr.bf16.mxu1 (!%p848_p4), %v1527_v52  ;;  %v874_v11 = vld [vmem:[#allocation2 + $0x50] sm:$0xff] (!%p848_p4)  ;;  %v875_v13 = vld [vmem:[#allocation2 + $0x58] sm:$0xff] (!%p848_p4)  ;;  %v865_v17 = vld [vmem:[#allocation2 + $0x8] sm:$0xff] (!%p848_p4) }
 0x293   : > { %v873_v18 = vld [vmem:[#allocation2 + $0x48] sm:$0xff] (!%p848_p4)  ;;  %v870_v25 = vld [vmem:[#allocation2 + $0x30] sm:$0xff] (!%p848_p4)  ;;  %v868_v27 = vld [vmem:[#allocation2 + $0x20] sm:$0xff] (!%p848_p4) }
 0x294   : > { %1680 = vmatpush3.bf16.msra.mxu0 (!%p848_p4), %v857_v50  ;;  %1782 = vmatpush3.bf16.msra.mxu1 (!%p848_p4), %v857_v50  ;;  %v878_v26 = vld [vmem:[#allocation2 + $0x70] sm:$0xff] (!%p848_p4)  ;;  %v876_v28 = vld [vmem:[#allocation2 + $0x60] sm:$0xff] (!%p848_p4)  ;;  %v871_v31 = vld [vmem:[#allocation2 + $0x38] sm:$0xff] (!%p848_p4) }
 0x295   : > { %1681 = vmatprep.subr.bf16.mxu0 (!%p848_p4), %v858_v53  ;;  %1775 = vmatprep.subr.bf16.mxu1 (!%p848_p4), %v858_v53  ;;  %v879_v32 = vld [vmem:[#allocation2 + $0x78] sm:$0xff] (!%p848_p4)  ;;  %v869_v37 = vld [vmem:[#allocation2 + $0x28] sm:$0xff] (!%p848_p4) }
 0x296   : > { %v877_v38 = vld [vmem:[#allocation2 + $0x68] sm:$0xff] }
 0x298   : > { %1682 = vmatpush3.bf16.msra.mxu0 %v858_v53  ;;  %1783 = vmatpush3.bf16.msra.mxu1 %v858_v53 }
 0x299   : > { %1683 = vmatprep.subr.bf16.mxu0 %v859_v54  ;;  %1776 = vmatprep.subr.bf16.mxu1 %v859_v54 }
 0x29c   : > { %1684 = vmatpush3.bf16.msra.mxu0 %v859_v54  ;;  %1784 = vmatpush3.bf16.msra.mxu1 %v859_v54 }
 0x29d   : > { %1685 = vmatprep.subr.bf16.mxu0 %v860_v1  ;;  %1777 = vmatprep.subr.bf16.mxu1 %v860_v1 }
 0x2a0   : > { %1686 = vmatpush3.bf16.msra.mxu0 %v860_v1  ;;  %1785 = vmatpush3.bf16.msra.mxu1 %v860_v1 }
 0x2a1   : > { %1687 = vmatprep.subr.bf16.mxu0 %v861_v2  ;;  %1778 = vmatprep.subr.bf16.mxu1 %v861_v2 }
 0x2a4   : > { %1688 = vmatpush3.bf16.msra.mxu0 %v861_v2  ;;  %1786 = vmatpush3.bf16.msra.mxu1 %v861_v2 }
 0x2a5   : > { %1689 = vmatprep.subr.bf16.mxu0 %v862_v9  ;;  %1779 = vmatprep.subr.bf16.mxu1 %v862_v9 }
 0x2a8   : > { %1690 = vmatpush3.bf16.msra.mxu0 %v862_v9  ;;  %1787 = vmatpush3.bf16.msra.mxu1 %v862_v9 }
 0x2a9   : > { %1691 = vmatprep.subr.bf16.mxu0 %v863_v10  ;;  %1780 = vmatprep.subr.bf16.mxu1 %v863_v10 }
 0x2ac   : > { %1692 = vmatpush3.bf16.msra.mxu0 %v863_v10  ;;  %1788 = vmatpush3.bf16.msra.mxu1 %v863_v10 }
 0x2af   : > { %1694 = vmatmul.mubr.bf16.vlgmr.msra.gmra.mrb[0].mxu0 %v1524_v55  ;;  %1702 = vmatmul.mubr.bf16.vlgmr.msra.gmra.mrb[0].mxu1 %v1528_v56 }
 0x2b0   : > { %1697 = vmatprep.mubr.bf16.mxu0 %v1525_v57  ;;  %1705 = vmatprep.mubr.bf16.mxu1 %v1529_v58 }
 0x2b7   : > { %1698 = vmatmul.mubr.bf16.gmra.mrb[4].mxu0 %v1526_v59  ;;  %1706 = vmatmul.mubr.bf16.gmra.mrb[4].mxu1 %v1530_v3 }
 0x382   : > { %v1695_v5 = vpop.f32.mrb[0].mxu0  ;;  %v1703_v6 = vpop.f32.mrb[0].mxu1 }
 0x383   : > { %v1027_v14 = vadd.f32 %v1695_v5, %v866_v4  ;;  %v1035_v62 = vadd.f32 %v1703_v6, %v874_v11  ;;  %v962_v63 = vpop.f32.mrb[1].mxu0  ;;  %v994_v0 = vpop.f32.mrb[1].mxu1 }
 0x384   : > { %v1025_v7 = vadd.f32 %v962_v63, %v864_v12  ;;  %v1033_v8 = vadd.f32 %v994_v0, %v872_v60  ;;  %v1696_v19 = vpop.f32.mrb[2].mxu0  ;;  %v1704_v15 = vpop.f32.mrb[2].mxu1 }
 0x385   : > { %1043 = vst [vmem:[#allocation2 + $0x10] sm:$0xff] %v1027_v14  ;;  %1051 = vst [vmem:[#allocation2 + $0x50] sm:$0xff] %v1035_v62  ;;  %v1028_v16 = vadd.f32 %v1696_v19, %v867_v61  ;;  %v1036_v20 = vadd.f32 %v1704_v15, %v875_v13  ;;  %v965_v21 = vpop.f32.mrb[3].mxu0  ;;  %v997_v22 = vpop.f32.mrb[3].mxu1 }
 0x386   : > { %1041 = vst [vmem:[#allocation2] sm:$0xff] %v1025_v7  ;;  %1049 = vst [vmem:[#allocation2 + $0x40] sm:$0xff] %v1033_v8  ;;  %v1026_v23 = vadd.f32 %v965_v21, %v865_v17  ;;  %v1034_v24 = vadd.f32 %v997_v22, %v873_v18 }
 0x387   : > { %1044 = vst [vmem:[#allocation2 + $0x18] sm:$0xff] %v1028_v16  ;;  %1052 = vst [vmem:[#allocation2 + $0x58] sm:$0xff] %v1036_v20 }
 0x388   : > { %1042 = vst [vmem:[#allocation2 + $0x8] sm:$0xff] %v1026_v23  ;;  %1050 = vst [vmem:[#allocation2 + $0x48] sm:$0xff] %v1034_v24 }
 0x38a   : > { %v1699_v29 = vpop.f32.mrb[4].mxu0  ;;  %v1707_v30 = vpop.f32.mrb[4].mxu1 }
 0x38b   : > { %v1031_v33 = vadd.f32 %v1699_v29, %v870_v25  ;;  %v1039_v34 = vadd.f32 %v1707_v30, %v878_v26  ;;  %v978_v35 = vpop.f32.mrb[5].mxu0  ;;  %v1010_v36 = vpop.f32.mrb[5].mxu1 }
 0x38c   : > { %v1029_v39 = vadd.f32 %v978_v35, %v868_v27  ;;  %v1037_v40 = vadd.f32 %v1010_v36, %v876_v28  ;;  %v1700_v41 = vpop.f32.mrb[6].mxu0  ;;  %v1708_v42 = vpop.f32.mrb[6].mxu1 }
 0x38d   : > { %1047 = vst [vmem:[#allocation2 + $0x30] sm:$0xff] %v1031_v33  ;;  %1055 = vst [vmem:[#allocation2 + $0x70] sm:$0xff] %v1039_v34  ;;  %v1032_v43 = vadd.f32 %v1700_v41, %v871_v31  ;;  %v1040_v44 = vadd.f32 %v1708_v42, %v879_v32  ;;  %v981_v45 = vpop.f32.mrb[7].mxu0  ;;  %v1013_v46 = vpop.f32.mrb[7].mxu1 }
 0x38e   : > { %1045 = vst [vmem:[#allocation2 + $0x20] sm:$0xff] %v1029_v39  ;;  %1053 = vst [vmem:[#allocation2 + $0x60] sm:$0xff] %v1037_v40  ;;  %v1030_v47 = vadd.f32 %v981_v45, %v869_v37  ;;  %v1038_v48 = vadd.f32 %v1013_v46, %v877_v38 }
 0x38f   : > { %1048 = vst [vmem:[#allocation2 + $0x38] sm:$0xff] %v1032_v43  ;;  %1056 = vst [vmem:[#allocation2 + $0x78] sm:$0xff] %v1040_v44 }
 0x390   : > { %1046 = vst [vmem:[#allocation2 + $0x28] sm:$0xff] %v1030_v47  ;;  %1054 = vst [vmem:[#allocation2 + $0x68] sm:$0xff] %v1038_v48 }
 0x391 PF: > { %v1906_v49 = vld [vmem:[%s2308_s11] sm:$0xff]   ;;  %v1907_v50 = vld [vmem:[%s2308_s11 + $0x8] sm:$0xff]   ;;  %v1908_v51 = vld [vmem:[%s2308_s11 + $0x10] sm:$0xff]   ;;  %p1540_p10 = scmp.ge.s32.totalorder %s2080_s18, 3 }
 0x392   : > { %1709 = vmatprep.subr.bf16.mxu0 %v1906_v49  ;;  %1789 = vmatprep.subr.bf16.mxu1 %v1906_v49  ;;  %v1909_v52 = vld [vmem:[%s2308_s11 + $0x18] sm:$0xff]   ;;  %v1060_v53 = vld [vmem:[#allocation2] sm:$0xff]  ;;  %v1061_v54 = vld [vmem:[#allocation2 + $0x8] sm:$0xff]  ;;  %p1541_p13 = scmp.ne.s32.totalorder (!%p1540_p10), %s2573_s9, 0 }
 0x393   : > { %1710 = vmatpush3.bf16.msra.mxu0 %v1906_v49  ;;  %1797 = vmatpush3.bf16.msra.mxu1 %v1906_v49  ;;  %v1068_v1 = vld [vmem:[#allocation2 + $0x40] sm:$0xff]  ;;  %v1076_v2 = vpack.c.bf16 %v1061_v54, %v1060_v53  ;;  %v1069_v9 = vld [vmem:[#allocation2 + $0x48] sm:$0xff]  ;;  %v1912_v57 = vld [vmem:[%s2308_s11 + $0x30] sm:$0xff]  }
 0x394   : > { %1711 = vmatprep.subr.bf16.mxu0 %v1907_v50  ;;  %1790 = vmatprep.subr.bf16.mxu1 %v1907_v50  ;;  %v1080_v10 = vpack.c.bf16 %v1069_v9, %v1068_v1  ;;  %v1910_v55 = vld [vmem:[%s2308_s11 + $0x20] sm:$0xff]   ;;  %v1911_v56 = vld [vmem:[%s2308_s11 + $0x28] sm:$0xff]   ;;  %v1913_v58 = vld [vmem:[%s2308_s11 + $0x38] sm:$0xff]  }
 0x395   : > { %1725 = vmatprep.mubr.bf16.mxu0 %v1076_v2  ;;  %v1062_v59 = vld [vmem:[#allocation2 + $0x10] sm:$0xff]  ;;  %v1063_v3 = vld [vmem:[#allocation2 + $0x18] sm:$0xff]  ;;  %v1064_v12 = vld [vmem:[#allocation2 + $0x20] sm:$0xff] }
 0x396   : > { %1733 = vmatprep.mubr.bf16.mxu1 %v1080_v10  ;;  %v1070_v4 = vld [vmem:[#allocation2 + $0x50] sm:$0xff]  ;;  %v1071_v11 = vld [vmem:[#allocation2 + $0x58] sm:$0xff]  ;;  %v1072_v5 = vld [vmem:[#allocation2 + $0x60] sm:$0xff]  ;;  %v1077_v61 = vpack.c.bf16 %v1063_v3, %v1062_v59 }
 0x397   : > { %1712 = vmatpush3.bf16.msra.mxu0 %v1907_v50  ;;  %1798 = vmatpush3.bf16.msra.mxu1 %v1907_v50  ;;  %v1065_v60 = vld [vmem:[#allocation2 + $0x28] sm:$0xff]  ;;  %v1081_v13 = vpack.c.bf16 %v1071_v11, %v1070_v4  ;;  %v1066_v63 = vld [vmem:[#allocation2 + $0x30] sm:$0xff]  ;;  %v1067_v0 = vld [vmem:[#allocation2 + $0x38] sm:$0xff] }
 0x398   : > { %1713 = vmatprep.subr.bf16.mxu0 %v1908_v51  ;;  %1791 = vmatprep.subr.bf16.mxu1 %v1908_v51  ;;  %v1073_v6 = vld [vmem:[#allocation2 + $0x68] sm:$0xff]  ;;  %v1078_v14 = vpack.c.bf16 %v1065_v60, %v1064_v12  ;;  %v1074_v17 = vld [vmem:[#allocation2 + $0x70] sm:$0xff]  ;;  %v1075_v18 = vld [vmem:[#allocation2 + $0x78] sm:$0xff]  ;;  %v1079_v7 = vpack.c.bf16 %v1067_v0, %v1066_v63 }
 0x399   : > { %v1082_v62 = vpack.c.bf16 %v1073_v6, %v1072_v5  ;;  %v1083_v8 = vpack.c.bf16 %v1075_v18, %v1074_v17  ;;  %v1531_v19 = vld [vmem:[%s313_s6] ss:$0 sm:$0xff] }
 0x39b   : > { %1714 = vmatpush3.bf16.msra.mxu0 %v1908_v51  ;;  %1799 = vmatpush3.bf16.msra.mxu1 %v1908_v51 }
 0x39c   : > { %1715 = vmatprep.subr.bf16.mxu0 %v1909_v52  ;;  %1792 = vmatprep.subr.bf16.mxu1 %v1909_v52 }
 0x39f   : > { %1716 = vmatpush3.bf16.msra.mxu0 %v1909_v52  ;;  %1800 = vmatpush3.bf16.msra.mxu1 %v1909_v52 }
 0x3a0   : > { %1717 = vmatprep.subr.bf16.mxu0 %v1910_v55  ;;  %1793 = vmatprep.subr.bf16.mxu1 %v1910_v55 }
 0x3a3   : > { %1718 = vmatpush3.bf16.msra.mxu0 %v1910_v55  ;;  %1801 = vmatpush3.bf16.msra.mxu1 %v1910_v55 }
 0x3a4   : > { %1719 = vmatprep.subr.bf16.mxu0 %v1911_v56  ;;  %1794 = vmatprep.subr.bf16.mxu1 %v1911_v56 }
 0x3a7   : > { %1720 = vmatpush3.bf16.msra.mxu0 %v1911_v56  ;;  %1802 = vmatpush3.bf16.msra.mxu1 %v1911_v56 }
 0x3a8   : > { %1721 = vmatprep.subr.bf16.mxu0 %v1912_v57  ;;  %1795 = vmatprep.subr.bf16.mxu1 %v1912_v57 }
 0x3ab   : > { %1722 = vmatpush3.bf16.msra.mxu0 %v1912_v57  ;;  %1803 = vmatpush3.bf16.msra.mxu1 %v1912_v57 }
 0x3ac   : > { %1723 = vmatprep.subr.bf16.mxu0 %v1913_v58  ;;  %1796 = vmatprep.subr.bf16.mxu1 %v1913_v58 }
 0x3af   : > { %1724 = vmatpush3.bf16.msra.mxu0 %v1913_v58  ;;  %1804 = vmatpush3.bf16.msra.mxu1 %v1913_v58 }
 0x3b2   : > { %1726 = vmatmul.mubr.bf16.vlgmr.msra.gmra.mrb[0].mxu0 %v1077_v61  ;;  %1734 = vmatmul.mubr.bf16.vlgmr.msra.gmra.mrb[0].mxu1 %v1081_v13 }
 0x3b3   : > { %1729 = vmatprep.mubr.bf16.mxu0 %v1078_v14  ;;  %1737 = vmatprep.mubr.bf16.mxu1 %v1082_v62 }
 0x3ba   : > { %1730 = vmatmul.mubr.bf16.gmra.mrb[4].mxu0 %v1079_v7  ;;  %1738 = vmatmul.mubr.bf16.gmra.mrb[4].mxu1 %v1083_v8 }
 0x485   : > { %v1727_v15 = vpop.f32.mrb[0].mxu0  ;;  %v1735_v16 = vpop.f32.mrb[0].mxu1 }
 0x486   : > { %v2431_v20 = vadd.f32 %v1727_v15, %v1531_v19  ;;  %v2433_v21 = vadd.f32 %v1735_v16, %v1531_v19  ;;  %v1189_v22 = vpop.f32.mrb[1].mxu0  ;;  %v1221_v23 = vpop.f32.mrb[1].mxu1 }
 0x487   : > { %v2435_v24 = vadd.f32 %v1531_v19, %v1189_v22  ;;  %v2437_v25 = vadd.f32 %v1531_v19, %v1221_v23  ;;  %v1728_v26 = vpop.f32.mrb[2].mxu0  ;;  %v1736_v27 = vpop.f32.mrb[2].mxu1 }
 0x488   : > { %v2439_v28 = vadd.f32 %v1728_v26, %v1531_v19  ;;  %v2441_v29 = vadd.f32 %v1736_v27, %v1531_v19  ;;  %v1192_v30 = vpop.f32.mrb[3].mxu0  ;;  %v1224_v31 = vpop.f32.mrb[3].mxu1  ;;  %v1258_v52 = vmax.f32 (!%p1540_p10), %v2431_v20, 0.0  ;;  %v1266_v56 = vmax.f32 (!%p1540_p10), %v2433_v21, 0.0 }
 0x489   : > { %v2443_v32 = vadd.f32 %v1531_v19, %v1192_v30  ;;  %v2445_v33 = vadd.f32 %v1531_v19, %v1224_v31  ;;  %v1256_v50 = vmax.f32 (!%p1540_p10), %v2435_v24, 0.0  ;;  %v1264_v10 = vmax.f32 (!%p1540_p10), %v2437_v25, 0.0 }
 0x48a   : > { %v1259_v53 = vmax.f32 (!%p1540_p10), %v2439_v28, 0.0  ;;  %v1267_v57 = vmax.f32 (!%p1540_p10), %v2441_v29, 0.0 }
 0x48b   : > { %1255 = sbr.rel (%p1540_p10) target bundleno = 1186 (0x4a2), region = 72  ;;  %v1257_v51 = vmax.f32 (!%p1540_p10), %v2443_v32, 0.0  ;;  %v1265_v55 = vmax.f32 (!%p1540_p10), %v2445_v33, 0.0 }
 0x48c   : > { %v1273_v12 = vpack.c.bf16 (!%p1540_p10), %v1259_v53, %v1258_v52  ;;  %v1277_v61 = vpack.c.bf16 (!%p1540_p10), %v1267_v57, %v1266_v56 }
 0x48d   : > { %v1731_v34 = vpop.f32.mrb[4].mxu0  ;;  %v1739_v35 = vpop.f32.mrb[4].mxu1  ;;  %v1272_v11 = vpack.c.bf16 (!%p1540_p10), %v1257_v51, %v1256_v50  ;;  %v1276_v6 = vpack.c.bf16 (!%p1540_p10), %v1265_v55, %v1264_v10 }
 0x48e   : > { %v2447_v36 = vadd.f32 %v1731_v34, %v1531_v19  ;;  %v2449_v37 = vadd.f32 %v1739_v35, %v1531_v19  ;;  %v1205_v38 = vpop.f32.mrb[5].mxu0  ;;  %v1237_v39 = vpop.f32.mrb[5].mxu1 }
 0x48f   : > { %v2451_v40 = vadd.f32 %v1531_v19, %v1205_v38  ;;  %v2453_v41 = vadd.f32 %v1531_v19, %v1237_v39  ;;  %v1732_v42 = vpop.f32.mrb[6].mxu0  ;;  %v1740_v43 = vpop.f32.mrb[6].mxu1 }
 0x490   : > { %v2455_v44 = vadd.f32 %v1732_v42, %v1531_v19  ;;  %v2457_v45 = vadd.f32 %v1740_v43, %v1531_v19  ;;  %v1208_v46 = vpop.f32.mrb[7].mxu0  ;;  %v1240_v47 = vpop.f32.mrb[7].mxu1  ;;  %v1262_v2 = vmax.f32 (!%p1540_p10), %v2447_v36, 0.0  ;;  %v1270_v3 = vmax.f32 (!%p1540_p10), %v2449_v37, 0.0 }
 0x491   : > { %v1209_v48 = vadd.f32 %v1531_v19, %v1208_v46  ;;  %v2459_v49 = vadd.f32 %v1531_v19, %v1240_v47  ;;  %v1260_v54 = vmax.f32 (!%p1540_p10), %v2451_v40, 0.0  ;;  %v1268_v58 = vmax.f32 (!%p1540_p10), %v2453_v41, 0.0 }
 0x492   : > { %v1263_v9 = vmax.f32 %v2455_v44, 0.0  ;;  %v1271_v4 = vmax.f32 %v2457_v45, 0.0  ;;  %1282 = sbr.rel (%p1541_p13) target bundleno = 1177 (0x499), region = 76  ;;  %1287 = vst [vmem:[#allocation3] sm:$0xff] (!%p1541_p13), %v1272_v11  ;;  %1288 = vst [vmem:[#allocation3 + $0x8] sm:$0xff] (!%p1541_p13), %v1273_v12 }
 0x493   : > { %v1261_v1 = vmax.f32 %v1209_v48, 0.0  ;;  %v1269_v59 = vmax.f32 %v2459_v49, 0.0  ;;  %1291 = vst [vmem:[#allocation3 + $0x20] sm:$0xff] (!%p1541_p13), %v1276_v6  ;;  %1292 = vst [vmem:[#allocation3 + $0x28] sm:$0xff] (!%p1541_p13), %v1277_v61 }
 0x494   : > { %v1275_v5 = vpack.c.bf16 %v1263_v9, %v1262_v2  ;;  %v1279_v14 = vpack.c.bf16 %v1271_v4, %v1270_v3 }
 0x495   : > { %v1274_v60 = vpack.c.bf16 %v1261_v1, %v1260_v54  ;;  %v1278_v13 = vpack.c.bf16 %v1269_v59, %v1268_v58 }
 0x496   : > { %1290 = vst [vmem:[#allocation3 + $0x18] sm:$0xff] (!%p1541_p13), %v1275_v5  ;;  %1294 = vst [vmem:[#allocation3 + $0x38] sm:$0xff] (!%p1541_p13), %v1279_v14 }
 0x497   : > { %1289 = vst [vmem:[#allocation3 + $0x10] sm:$0xff] (!%p1541_p13), %v1274_v60  ;;  %1293 = vst [vmem:[#allocation3 + $0x30] sm:$0xff] (!%p1541_p13), %v1278_v13 }
 0x499 PF: > { %p1542_p5 = scmp.ne.s32.totalorder %s2573_s9, 1 }
 0x49a   : > { %1302 = vst [vmem:[#allocation4] sm:$0xff] (!%p1542_p5), %v1272_v11  ;;  %1303 = vst [vmem:[#allocation4 + $0x8] sm:$0xff] (!%p1542_p5), %v1273_v12 }
 0x49b   : > { %1297 = sbr.rel (%p1542_p5) target bundleno = 1186 (0x4a2), region = 80  ;;  %1304 = vst [vmem:[#allocation4 + $0x10] sm:$0xff] (!%p1542_p5), %v1274_v60  ;;  %1305 = vst [vmem:[#allocation4 + $0x18] sm:$0xff] (!%p1542_p5), %v1275_v5 }
 0x49c   : > { %1306 = vst [vmem:[#allocation4 + $0x20] sm:$0xff] (!%p1542_p5), %v1276_v6  ;;  %1307 = vst [vmem:[#allocation4 + $0x28] sm:$0xff] (!%p1542_p5), %v1277_v61 }
 0x49d   : > { %1308 = vst [vmem:[#allocation4 + $0x30] sm:$0xff] (!%p1542_p5), %v1278_v13  ;;  %1309 = vst [vmem:[#allocation4 + $0x38] sm:$0xff] (!%p1542_p5), %v1279_v14 }
 0x4a2 PF: > { %p1543_p6 = scmp.ne.s32.totalorder %s2080_s18, 3 }
 0x4a3   : > { %1314 = vst [vmem:[#allocation11] sm:$0xff] (!%p1543_p6), %v2435_v24  ;;  %1315 = vst [vmem:[#allocation11 + $0x8] sm:$0xff] (!%p1543_p6), %v2443_v32 }
 0x4a4   : > { %1313 = sbr.rel (%p1543_p6) target bundleno = 1195 (0x4ab), region = 84  ;;  %1316 = vst [vmem:[#allocation11 + $0x10] sm:$0xff] (!%p1543_p6), %v2431_v20  ;;  %1317 = vst [vmem:[#allocation11 + $0x18] sm:$0xff] (!%p1543_p6), %v2439_v28 }
 0x4a5   : > { %1318 = vst [vmem:[#allocation11 + $0x20] sm:$0xff] (!%p1543_p6), %v2451_v40  ;;  %1319 = vst [vmem:[#allocation11 + $0x28] sm:$0xff] (!%p1543_p6), %v1209_v48 }
 0x4a6   : > { %1320 = vst [vmem:[#allocation11 + $0x30] sm:$0xff] (!%p1543_p6), %v2447_v36  ;;  %1321 = vst [vmem:[#allocation11 + $0x38] sm:$0xff] (!%p1543_p6), %v2455_v44 }
 0x4a7   : > { %1322 = vst [vmem:[#allocation11 + $0x40] sm:$0xff] (!%p1543_p6), %v2437_v25  ;;  %1323 = vst [vmem:[#allocation11 + $0x48] sm:$0xff] (!%p1543_p6), %v2445_v33 }
 0x4a8   : > { %1324 = vst [vmem:[#allocation11 + $0x50] sm:$0xff] (!%p1543_p6), %v2433_v21  ;;  %1325 = vst [vmem:[#allocation11 + $0x58] sm:$0xff] (!%p1543_p6), %v2441_v29 }
 0x4a9   : > { %1326 = vst [vmem:[#allocation11 + $0x60] sm:$0xff] (!%p1543_p6), %v2453_v41  ;;  %1327 = vst [vmem:[#allocation11 + $0x68] sm:$0xff] (!%p1543_p6), %v2459_v49 }
 0x4aa   : > { %1328 = vst [vmem:[#allocation11 + $0x70] sm:$0xff] (!%p1543_p6), %v2449_v37  ;;  %1329 = vst [vmem:[#allocation11 + $0x78] sm:$0xff] (!%p1543_p6), %v2457_v45 }
 0x4ab PF: > { %p1839_p2 = scmp.eq.s32.totalorder %s2189_s14, 3  ;;  %s2096_s18 = smov [#allocation11]  }
 0x4ac   : > { %s1346_s12 = sshll.u32 %s2096_s18, 4  ;;  %s1347_s12 = int_to_ptr.vmem [resolvable:$true] %s1346_s12 }
 0x4ad   : > { %s2000_s24 = scalar_lea.vmem %s1347_s12, 2048  ;;  %s2006_s29 = scalar_lea.vmem %s1347_s12, 4096 }
 0x4ae   : > { %p2001_p8 = scmp.ne.s32.totalorder %s1347_s12, %s2000_s24  ;;  %p2007_p0 = scmp.lt.s32.totalorder %s1347_s12, %s1347_s12 }
 0x4af   : > { %p2008_p3 = scmp.lt.s32.totalorder %s2006_s29, %s2000_s24 }
 0x4b0   : > { %p2002_p9 = pnand %p2001_p8, %p1839_p2 }
 0x4b1   : > { %p2009_p7 = por %p2008_p3, %p2007_p0 }
 0x4b2   : > { %p2003_p11 = pneg %p2002_p9 }
 0x4b4   : > { %p2010_p12 = pnand %p2009_p7, %p2003_p11 }
 0x4b6   : > { %2013 = shalt.err (!%p2010_p12)
}
 0x4b7   : > { %s2014_s10 = scalar_lea.hbm %s2539_s4, 2048 }
 0x4b8   : > { %p2015_p1 = scmp.ne.s32.totalorder %s2539_s4, %s2014_s10  ;;  %p2020_p13 = scmp.lt.u32.totalorder %s2014_s10, %s2539_s4 }
 0x4ba   : > { %p2016_p4 = pnand %p2015_p1, %p1839_p2 }
 0x4bc   : > { %p2017_p10 = pneg %p2016_p4 }
 0x4be   : > { %p2022_p5 = pnand %p2020_p13, %p2017_p10 }
 0x4c0   : > { %2025 = shalt.err (!%p2022_p5)
}
 0x4c1   : > { %s2097_s6 = smov 128   ;;  %s2098_s5 = smov 8  }
 0x4c2   : > { %1816 = dma.vmem_to_hbm [thread:$0]  (%p1839_p2), %s1347_s12, 2048, %s2539_s4, [#allocation7], %s2097_s6, %s2097_s6, %s2098_s5  }
 0x4c3 PF: > { %p1840_p6 = scmp.ge.s32.totalorder %s2088_s20, 2  ;;  %s2562_s27 = sadd.s32 4294967294, %s2088_s20  }
 0x4c4   : > { %p1841_p8 = scmp.eq.s32.totalorder %s2562_s27, 3 }
 0x4c6   : > { %p1831_p9 = pnand %p1841_p8, %p1840_p6 }
 0x4c8   : > { %2063 = dma.done.wait (!%p1831_p9), [#allocation7], 2048  }
 0x4c9   : > { %2065 = vsyncadd (!%p1831_p9), [#allocation7], 4294965248  ;;  %s21_s20 = sadd.s32 1, %s2088_s20   ;;  %s2563_s15 = smov %s2072_s16 }
 0x4ca   : > { %p18_p11 = scmp.ge.s32.totalorder %s21_s20, 6   ;;  %s2564_s16 = smov %s2076_s17 }
 0x4cb   : > { %s2565_s17 = smov %s2263_s25  ;;  %s2566_s18 = smov %s2084_s19 }
 0x4cc   : > { %s2567_s19 = smov %s2569_s28  ;;  %20 = sbr.rel (!%p18_p11) target bundleno = 7 (0x7), region = 141 }
 0x4d3   :  { %1367 = vsyncpa [#allocation6], 1 }
 0x4d4   :  { %1369 = vsyncpa [#allocation6 + $0x1], 1 }
 0x4d5   :  { %1370 = vsyncpa [#allocation9], 1 }
 0x4d6   :  { %1372 = vsyncpa [#allocation9 + $0x1], 1 }
 0x4d7   :  { %1373 = vsyncpa [#allocation7], 1 }
 0x4d8   :  { %1375 = vsyncpa [#allocation7 + $0x1], 1 }

</bundles_post_ra>
